<compile_context>
chip_gen: v7x
topology: tpu7x:2x2x1
jax: 0.10.0
libtpu: 0.0.40
codegen_flags: <defaults>
</compile_context>

<pallas_src>
import math

import jax
import jax.numpy as jnp
import numpy as np
from jax.experimental import pallas as pl
from jax.experimental.pallas import tpu as pltpu

EPS = 1e-5
OUT_LANES = 128  # lane-dense combined output block width


def _round_up(x, m):
    return ((x + m - 1) // m) * m


# --------------------------------------------------------------------------- kernel
def actor_critic_kernel(state_ref, action_ref, ws_ref, w2h_ref, w3_ref, vec_ref, out_ref):
    s = state_ref.shape[1]             # state_size
    a = action_ref.shape[1]            # action_size
    fc2p = w2h_ref.shape[1] // 2       # padded fc2 width

    state = state_ref[...]             # (B, S)  f32
    action = action_ref[...]           # (B, A)  f32

    # ---- unpack the parameter slabs (static slices of VMEM refs) -------------------
    w1 = ws_ref[0:s, :]                # (S, FC1P)        bf16
    w2ca = ws_ref[s:s + a, 0:fc2p]     # (A, FC2P)        bf16  (critic action weights)
    w2a = w2h_ref[:, 0:fc2p]           # (FC1P, FC2P)     bf16  (fc2_actor)
    w2cs = w2h_ref[:, fc2p:2 * fc2p]   # (FC1P, FC2P)     bf16  (fc2_critic state part)
    w3 = w3_ref[...]                   # (2*FC2P, A+1)    bf16  block-diag [w3a 0; 0 w3c]

    b1 = vec_ref[0:1, :]               # fc1 bias
    g1a = vec_ref[1:2, :]              # BN1 (actor) gamma / beta
    be1a = vec_ref[2:3, :]
    g1c = vec_ref[3:4, :]              # BN1 (critic) gamma / beta
    be1c = vec_ref[4:5, :]
    b2a = vec_ref[5:6, 0:fc2p]         # fc2_actor bias
    g2a = vec_ref[6:7, 0:fc2p]         # BN2 (actor) gamma / beta
    be2a = vec_ref[7:8, 0:fc2p]
    b2c = vec_ref[8:9, 0:fc2p]         # fc2_critic bias
    b3 = vec_ref[9:10, 0:a + 1]        # [fc3_actor bias | fc3_critic bias]

    # ---- shared fc1 + ReLU (bf16 operands, f32 MXU accumulation) -------------------
    h1 = jnp.maximum(
        jnp.dot(state.astype(jnp.bfloat16), w1, preferred_element_type=jnp.float32) + b1,
        0.0,
    )                                                             # (B, FC1P) f32

    # ---- shared BN statistics of h1, computed ONCE, folded scale/shift -------------
    mu1 = jnp.mean(h1, axis=0, keepdims=True)
    var1 = jnp.mean(jnp.square(h1 - mu1), axis=0, keepdims=True)
    inv1 = jax.lax.rsqrt(var1 + EPS)
    sa = g1a * inv1
    sc = g1c * inv1
    ha = h1 * sa + (be1a - mu1 * sa)   # actor-branch BN1
    hc = h1 * sc + (be1c - mu1 * sc)   # critic-branch BN1

    # ---- actor branch: fc2_actor + ReLU + BN2 --------------------------------------
    h2a = jnp.maximum(
        jnp.dot(ha.astype(jnp.bfloat16), w2a, preferred_element_type=jnp.float32) + b2a,
        0.0,
    )
    mu2 = jnp.mean(h2a, axis=0, keepdims=True)
    var2 = jnp.mean(jnp.square(h2a - mu2), axis=0, keepdims=True)
    s2 = g2a * jax.lax.rsqrt(var2 + EPS)
    h2a = h2a * s2 + (be2a - mu2 * s2)

    # ---- critic branch: fc2_critic(cat(xs, action)) + ReLU --------------------------
    h2c = jnp.maximum(
        jnp.dot(hc.astype(jnp.bfloat16), w2cs, preferred_element_type=jnp.float32)
        + jnp.dot(action.astype(jnp.bfloat16), w2ca, preferred_element_type=jnp.float32)
        + b2c,
        0.0,
    )

    # ---- fused heads: [h2a | h2c] @ blockdiag(w3a, w3c) + [b3a | b3c] ---------------
    hcat = jnp.concatenate([h2a, h2c], axis=1).astype(jnp.bfloat16)   # (B, 2*FC2P)
    head = jnp.dot(hcat, w3, preferred_element_type=jnp.float32) + b3  # (B, A+1) f32

    # ---- single lane-dense output block: actor in cols [0,A), critic in col A ------
    out_ref[...] = jnp.zeros_like(out_ref)
    out_ref[:, 0:a] = jnp.tanh(head[:, 0:a])
    out_ref[:, a:a + 1] = head[:, a:a + 1]


def _full_spec(shape):
    n = len(shape)
    return pl.BlockSpec(shape, lambda i, n=n: (0,) * n)


# --------------------------------------------------------------------------- wrapper
def actor_critic_forward(state, action, packed):
    b = state.shape[0]
    a = action.shape[1]
    assert a + 1 <= OUT_LANES

    inputs = (state, action, packed["w_small"], packed["w2h"], packed["w3"], packed["vec"])

    fc1p = packed["w2h"].shape[0]
    fc2p = packed["w2h"].shape[1] // 2
    flops = 2 * b * (
        state.shape[1] * fc1p          # fc1
        + 2 * fc1p * fc2p              # fc2_actor + fc2_critic (state part)
        + a * fc2p                     # fc2_critic (action part)
        + 2 * fc2p * (a + 1)           # fused heads
    )
    bytes_accessed = sum(int(x.size) * x.dtype.itemsize for x in inputs) + b * OUT_LANES * 4
    cost = pl.CostEstimate(
        flops=int(flops),
        transcendentals=int(b * a + fc1p + fc2p),   # tanh + rsqrt
        bytes_accessed=int(bytes_accessed),
    )

    out = pl.pallas_call(
        actor_critic_kernel,
        out_shape=jax.ShapeDtypeStruct((b, OUT_LANES), jnp.float32),
        grid=(1,),
        in_specs=[_full_spec(x.shape) for x in inputs],
        out_specs=_full_spec((b, OUT_LANES)),
        compiler_params=pltpu.CompilerParams(dimension_semantics=("arbitrary",)),
        cost_estimate=cost,
    )(*inputs)

    return out[:, :a], out[:, a:a + 1]


# --------------------------------------------------------------------------- params
def init_params(key, state_size, action_size, fc1_units=400, fc2_units=300):
    """Build (packed kernel params, raw reference params). Mimics reset_parameters ranges."""
    fc1p = _round_up(fc1_units, 128)   # 400 -> 512
    fc2p = _round_up(fc2_units, 128)   # 300 -> 384
    keys = jax.random.split(key, 10)

    def uni(k, shape, lim):
        return jax.random.uniform(k, shape, jnp.float32, -lim, lim)

    lim1 = 1.0 / math.sqrt(state_size)
    lim2a = 1.0 / math.sqrt(fc1_units)
    lim2c = 1.0 / math.sqrt(fc1_units + action_size)
    lim3 = 1.0 / math.sqrt(fc2_units)

    w1 = uni(keys[0], (state_size, fc1_units), lim1)
    b1 = uni(keys[1], (fc1_units,), lim1)
    w2a = uni(keys[2], (fc1_units, fc2_units), lim2a)
    b2a = uni(keys[3], (fc2_units,), lim2a)
    w3a = uni(keys[4], (fc2_units, action_size), 3e-3)
    b3a = uni(keys[5], (action_size,), lim3)
    w2c = uni(keys[6], (fc1_units + action_size, fc2_units), lim2c)
    b2c = uni(keys[7], (fc2_units,), lim2c)
    w3c = uni(keys[8], (fc2_units, 1), 3e-3)
    b3c = uni(keys[9], (1,), lim3)

    g1 = jnp.ones((fc1_units,), jnp.float32)
    z1 = jnp.zeros((fc1_units,), jnp.float32)
    g2 = jnp.ones((fc2_units,), jnp.float32)
    z2 = jnp.zeros((fc2_units,), jnp.float32)

    # ---- raw (unpadded, original nn.Module structure) params for the reference ----
    raw = {
        "w1": w1.astype(jnp.bfloat16), "b1": b1,
        "w2a": w2a.astype(jnp.bfloat16), "b2a": b2a,
        "w3a": w3a.astype(jnp.bfloat16), "b3a": b3a,
        "w2c": w2c.astype(jnp.bfloat16), "b2c": b2c,
        "w3c": w3c.astype(jnp.bfloat16), "b3c": b3c,
        "g1a": g1, "be1a": z1, "g1c": g1, "be1c": z1, "g2a": g2, "be2a": z2,
    }

    # ---- padded / packed slabs consumed by the kernel ------------------------------
    def pad2(w, rows, cols):
        return jnp.zeros((rows, cols), jnp.float32).at[: w.shape[0], : w.shape[1]].set(w)

    def pad1(v, cols):
        return jnp.zeros((cols,), jnp.float32).at[: v.shape[0]].set(v)

    # slab 1 (bf16): fc1 weight + critic action weight stacked along sublanes.
    w_small = jnp.concatenate(
        [pad2(w1, state_size, fc1p), pad2(w2c[fc1_units:], action_size, fc1p)], axis=0
    ).astype(jnp.bfloat16)                                   # (S+A, FC1P)

    # slab 2 (bf16): the two big hidden-layer weights side by side along lanes.
    w2h = jnp.concatenate(
        [pad2(w2a, fc1p, fc2p), pad2(w2c[:fc1_units], fc1p, fc2p)], axis=1
    ).astype(jnp.bfloat16)                                   # (FC1P, 2*FC2P)

    # slab 3 (bf16): block-diagonal output head [w3a 0; 0 w3c].
    w3 = jnp.zeros((2 * fc2p, action_size + 1), jnp.float32)
    w3 = w3.at[:fc2_units, :action_size].set(w3a)
    w3 = w3.at[fc2p:fc2p + fc2_units, action_size:].set(w3c)
    w3 = w3.astype(jnp.bfloat16)                             # (2*FC2P, A+1)

    # slab 4 (f32): biases + BN affine params, one row each, width FC1P.
    vec = jnp.stack([
        pad1(b1, fc1p),                           # 0: fc1 bias
        pad1(g1, fc1p),                           # 1: BN1 actor gamma
        pad1(z1, fc1p),                           # 2: BN1 actor beta
        pad1(g1, fc1p),                           # 3: BN1 critic gamma
        pad1(z1, fc1p),                           # 4: BN1 critic beta
        pad1(b2a, fc1p),                          # 5: fc2_actor bias
        pad1(g2, fc1p),                           # 6: BN2 actor gamma
        pad1(z2, fc1p),                           # 7: BN2 actor beta
        pad1(b2c, fc1p),                          # 8: fc2_critic bias
        pad1(jnp.concatenate([b3a, b3c]), fc1p),  # 9: [fc3_actor bias | fc3_critic bias]
    ], axis=0)                                               # (10, FC1P) f32

    packed = {"w_small": w_small, "w2h": w2h, "w3": w3, "vec": vec}
    return packed, raw


# --------------------------------------------------------------------------- reference
def _bn_fold(x, gamma, beta):
    """Training-mode BatchNorm1d (batch stats, biased var), folded scale/shift form."""
    mu = jnp.mean(x, axis=0, keepdims=True)
    var = jnp.mean(jnp.square(x - mu), axis=0, keepdims=True)
    scale = gamma * jax.lax.rsqrt(var + EPS)
    return x * scale + (beta - mu * scale)


def _bdot(x, w):
    return jnp.dot(x.astype(jnp.bfloat16), w, preferred_element_type=jnp.float32)


def reference_forward(state, action, raw):
    """Pure-JAX reference with the ORIGINAL module structure (unpadded, unpacked weights)."""
    h1 = jnp.maximum(_bdot(state, raw["w1"]) + raw["b1"], 0.0)

    # sequential_actor
    xa = _bn_fold(h1, raw["g1a"], raw["be1a"])
    xa = jnp.maximum(_bdot(xa, raw["w2a"]) + raw["b2a"], 0.0)
    xa = _bn_fold(xa, raw["g2a"], raw["be2a"])
    actor = jnp.tanh(_bdot(xa, raw["w3a"]) + raw["b3a"])

    # sequential_critic + fc2_critic(cat) + fc3_critic
    xs = _bn_fold(h1, raw["g1c"], raw["be1c"])
    xc = jnp.concatenate([xs, action], axis=1)
    xc = jnp.maximum(_bdot(xc, raw["w2c"]) + raw["b2c"], 0.0)
    critic = _bdot(xc, raw["w3c"]) + raw["b3c"]
    return actor, critic


# --------------------------------------------------------------------------- main
if __name__ == "__main__":
    BATCH = 8          # BN needs batch >= 2; 8 = one sublane tile
    STATE_SIZE = 16
    ACTION_SIZE = 4

    root = jax.random.PRNGKey(0)
    k_params, k_state, k_action = jax.random.split(root, 3)

    packed, raw = init_params(k_params, STATE_SIZE, ACTION_SIZE)
    state = jax.random.normal(k_state, (BATCH, STATE_SIZE), jnp.float32)
    action = jax.random.uniform(k_action, (BATCH, ACTION_SIZE), jnp.float32, -1.0, 1.0)

    actor_out, critic_out = actor_critic_forward(state, action, packed)
    jax.block_until_ready((actor_out, critic_out))

    ref_actor, ref_critic = reference_forward(state, action, raw)
    np.testing.assert_allclose(np.asarray(actor_out), np.asarray(ref_actor),
                               rtol=2e-3, atol=2e-3)
    np.testing.assert_allclose(np.asarray(critic_out), np.asarray(ref_critic),
                               rtol=2e-3, atol=2e-3)

    assert actor_out.shape == (BATCH, ACTION_SIZE)
    assert critic_out.shape == (BATCH, 1)

    print("KERNEL_OK")
</pallas_src>

<mosaic_0001>
module attributes {stable_mosaic.version = 11 : i64} {
  func.func @actor_critic_kernel(%arg0: i32, %arg1: memref<8x16xf32, #tpu.memory_space<vmem>>, %arg2: memref<8x4xf32, #tpu.memory_space<vmem>>, %arg3: memref<20x512xbf16, #tpu.memory_space<vmem>>, %arg4: memref<512x768xbf16, #tpu.memory_space<vmem>>, %arg5: memref<768x5xbf16, #tpu.memory_space<vmem>>, %arg6: memref<10x512xf32, #tpu.memory_space<vmem>>, %arg7: memref<8x128xf32, #tpu.memory_space<vmem>>) attributes {dimension_semantics = [#tpu.dimension_semantics<arbitrary>], iteration_bounds = array<i64: 1>, scalar_prefetch = 0 : i64, scratch_operands = 0 : i64, tpu.core_type = #tpu.core_type<tc>, window_params = [{pipeline_mode = #tpu.pipeline_mode<synchronous>, transform_indices = @transform_0, window_bounds = array<i64: 8, 16>}, {pipeline_mode = #tpu.pipeline_mode<synchronous>, transform_indices = @transform_1, window_bounds = array<i64: 8, 4>}, {pipeline_mode = #tpu.pipeline_mode<synchronous>, transform_indices = @transform_2, window_bounds = array<i64: 20, 512>}, {pipeline_mode = #tpu.pipeline_mode<synchronous>, transform_indices = @transform_3, window_bounds = array<i64: 512, 768>}, {pipeline_mode = #tpu.pipeline_mode<synchronous>, transform_indices = @transform_4, window_bounds = array<i64: 768, 5>}, {pipeline_mode = #tpu.pipeline_mode<synchronous>, transform_indices = @transform_5, window_bounds = array<i64: 10, 512>}, {pipeline_mode = #tpu.pipeline_mode<synchronous>, transform_indices = @transform_6, window_bounds = array<i64: 8, 128>}]} {
    %c0 = arith.constant 0 : index
    %c0_0 = arith.constant 0 : index
    %0 = vector.load %arg1[%c0, %c0_0] : memref<8x16xf32, #tpu.memory_space<vmem>>, vector<8x16xf32>
    %c0_1 = arith.constant 0 : index
    %c0_2 = arith.constant 0 : index
    %1 = vector.load %arg2[%c0_1, %c0_2] : memref<8x4xf32, #tpu.memory_space<vmem>>, vector<8x4xf32>
    %c0_3 = arith.constant 0 : index
    %c0_4 = arith.constant 0 : index
    %2 = vector.load %arg3[%c0_3, %c0_4] : memref<20x512xbf16, #tpu.memory_space<vmem>>, vector<16x512xbf16>
    %c16 = arith.constant 16 : index
    %c0_5 = arith.constant 0 : index
    %3 = vector.load %arg3[%c16, %c0_5] : memref<20x512xbf16, #tpu.memory_space<vmem>>, vector<4x384xbf16>
    %c0_6 = arith.constant 0 : index
    %c0_7 = arith.constant 0 : index
    %4 = vector.load %arg4[%c0_6, %c0_7] : memref<512x768xbf16, #tpu.memory_space<vmem>>, vector<512x384xbf16>
    %c0_8 = arith.constant 0 : index
    %c384 = arith.constant 384 : index
    %5 = vector.load %arg4[%c0_8, %c384] : memref<512x768xbf16, #tpu.memory_space<vmem>>, vector<512x384xbf16>
    %c0_9 = arith.constant 0 : index
    %c0_10 = arith.constant 0 : index
    %6 = vector.load %arg5[%c0_9, %c0_10] : memref<768x5xbf16, #tpu.memory_space<vmem>>, vector<768x5xbf16>
    %c0_11 = arith.constant 0 : index
    %c0_12 = arith.constant 0 : index
    %7 = vector.load %arg6[%c0_11, %c0_12] : memref<10x512xf32, #tpu.memory_space<vmem>>, vector<1x512xf32>
    %c1 = arith.constant 1 : index
    %c0_13 = arith.constant 0 : index
    %8 = vector.load %arg6[%c1, %c0_13] : memref<10x512xf32, #tpu.memory_space<vmem>>, vector<1x512xf32>
    %c2 = arith.constant 2 : index
    %c0_14 = arith.constant 0 : index
    %9 = vector.load %arg6[%c2, %c0_14] : memref<10x512xf32, #tpu.memory_space<vmem>>, vector<1x512xf32>
    %c3 = arith.constant 3 : index
    %c0_15 = arith.constant 0 : index
    %10 = vector.load %arg6[%c3, %c0_15] : memref<10x512xf32, #tpu.memory_space<vmem>>, vector<1x512xf32>
    %c4 = arith.constant 4 : index
    %c0_16 = arith.constant 0 : index
    %11 = vector.load %arg6[%c4, %c0_16] : memref<10x512xf32, #tpu.memory_space<vmem>>, vector<1x512xf32>
    %c5 = arith.constant 5 : index
    %c0_17 = arith.constant 0 : index
    %12 = vector.load %arg6[%c5, %c0_17] : memref<10x512xf32, #tpu.memory_space<vmem>>, vector<1x384xf32>
    %c6 = arith.constant 6 : index
    %c0_18 = arith.constant 0 : index
    %13 = vector.load %arg6[%c6, %c0_18] : memref<10x512xf32, #tpu.memory_space<vmem>>, vector<1x384xf32>
    %c7 = arith.constant 7 : index
    %c0_19 = arith.constant 0 : index
    %14 = vector.load %arg6[%c7, %c0_19] : memref<10x512xf32, #tpu.memory_space<vmem>>, vector<1x384xf32>
    %c8 = arith.constant 8 : index
    %c0_20 = arith.constant 0 : index
    %15 = vector.load %arg6[%c8, %c0_20] : memref<10x512xf32, #tpu.memory_space<vmem>>, vector<1x384xf32>
    %c9 = arith.constant 9 : index
    %c0_21 = arith.constant 0 : index
    %16 = vector.load %arg6[%c9, %c0_21] : memref<10x512xf32, #tpu.memory_space<vmem>>, vector<1x5xf32>
    %17 = arith.truncf %0 : vector<8x16xf32> to vector<8x16xbf16>
    %cst = arith.constant dense<0.000000e+00> : vector<8x512xf32>
    %18 = tpu.matmul %17, %2, %cst {dimension_numbers = #tpu.dot_dimension_numbers<[1], [0], [0], [1], [0, 0, 1, 1], [], []>} : vector<8x16xbf16>, vector<16x512xbf16>, vector<8x512xf32> -> vector<8x512xf32>
    %19 = vector.broadcast %7 : vector<1x512xf32> to vector<8x512xf32>
    %20 = arith.addf %18, %19 : vector<8x512xf32>
    %cst_22 = arith.constant 0.000000e+00 : f32
    %21 = vector.broadcast %cst_22 : f32 to vector<8x512xf32>
    %22 = arith.maximumf %20, %21 : vector<8x512xf32>
    %cst_23 = arith.constant dense<0.000000e+00> : vector<512xf32>
    %23 = vector.multi_reduction <add>, %22, %cst_23 [0] : vector<8x512xf32> to vector<512xf32>
    %24 = vector.shape_cast %23 : vector<512xf32> to vector<1x512xf32>
    %cst_24 = arith.constant 8.000000e+00 : f32
    %25 = vector.broadcast %cst_24 : f32 to vector<1x512xf32>
    %26 = arith.divf %24, %25 : vector<1x512xf32>
    %27 = vector.broadcast %26 : vector<1x512xf32> to vector<8x512xf32>
    %28 = arith.subf %22, %27 : vector<8x512xf32>
    %29 = arith.mulf %28, %28 : vector<8x512xf32>
    %cst_25 = arith.constant dense<0.000000e+00> : vector<512xf32>
    %30 = vector.multi_reduction <add>, %29, %cst_25 [0] : vector<8x512xf32> to vector<512xf32>
    %31 = vector.shape_cast %30 : vector<512xf32> to vector<1x512xf32>
    %cst_26 = arith.constant 8.000000e+00 : f32
    %32 = vector.broadcast %cst_26 : f32 to vector<1x512xf32>
    %33 = arith.divf %31, %32 : vector<1x512xf32>
    %cst_27 = arith.constant 9.99999974E-6 : f32
    %34 = vector.broadcast %cst_27 : f32 to vector<1x512xf32>
    %35 = arith.addf %33, %34 : vector<1x512xf32>
    %36 = math.rsqrt %35 : vector<1x512xf32>
    %37 = arith.mulf %8, %36 : vector<1x512xf32>
    %38 = arith.mulf %10, %36 : vector<1x512xf32>
    %39 = vector.broadcast %37 : vector<1x512xf32> to vector<8x512xf32>
    %40 = arith.mulf %22, %39 : vector<8x512xf32>
    %41 = arith.mulf %26, %37 : vector<1x512xf32>
    %42 = arith.subf %9, %41 : vector<1x512xf32>
    %43 = vector.broadcast %42 : vector<1x512xf32> to vector<8x512xf32>
    %44 = arith.addf %40, %43 : vector<8x512xf32>
    %45 = vector.broadcast %38 : vector<1x512xf32> to vector<8x512xf32>
    %46 = arith.mulf %22, %45 : vector<8x512xf32>
    %47 = arith.mulf %26, %38 : vector<1x512xf32>
    %48 = arith.subf %11, %47 : vector<1x512xf32>
    %49 = vector.broadcast %48 : vector<1x512xf32> to vector<8x512xf32>
    %50 = arith.addf %46, %49 : vector<8x512xf32>
    %51 = arith.truncf %44 : vector<8x512xf32> to vector<8x512xbf16>
    %cst_28 = arith.constant dense<0.000000e+00> : vector<8x384xf32>
    %52 = tpu.matmul %51, %4, %cst_28 {dimension_numbers = #tpu.dot_dimension_numbers<[1], [0], [0], [1], [0, 0, 1, 1], [], []>} : vector<8x512xbf16>, vector<512x384xbf16>, vector<8x384xf32> -> vector<8x384xf32>
    %53 = vector.broadcast %12 : vector<1x384xf32> to vector<8x384xf32>
    %54 = arith.addf %52, %53 : vector<8x384xf32>
    %cst_29 = arith.constant 0.000000e+00 : f32
    %55 = vector.broadcast %cst_29 : f32 to vector<8x384xf32>
    %56 = arith.maximumf %54, %55 : vector<8x384xf32>
    %cst_30 = arith.constant dense<0.000000e+00> : vector<384xf32>
    %57 = vector.multi_reduction <add>, %56, %cst_30 [0] : vector<8x384xf32> to vector<384xf32>
    %58 = vector.shape_cast %57 : vector<384xf32> to vector<1x384xf32>
    %cst_31 = arith.constant 8.000000e+00 : f32
    %59 = vector.broadcast %cst_31 : f32 to vector<1x384xf32>
    %60 = arith.divf %58, %59 : vector<1x384xf32>
    %61 = vector.broadcast %60 : vector<1x384xf32> to vector<8x384xf32>
    %62 = arith.subf %56, %61 : vector<8x384xf32>
    %63 = arith.mulf %62, %62 : vector<8x384xf32>
    %cst_32 = arith.constant dense<0.000000e+00> : vector<384xf32>
    %64 = vector.multi_reduction <add>, %63, %cst_32 [0] : vector<8x384xf32> to vector<384xf32>
    %65 = vector.shape_cast %64 : vector<384xf32> to vector<1x384xf32>
    %cst_33 = arith.constant 8.000000e+00 : f32
    %66 = vector.broadcast %cst_33 : f32 to vector<1x384xf32>
    %67 = arith.divf %65, %66 : vector<1x384xf32>
    %cst_34 = arith.constant 9.99999974E-6 : f32
    %68 = vector.broadcast %cst_34 : f32 to vector<1x384xf32>
    %69 = arith.addf %67, %68 : vector<1x384xf32>
    %70 = math.rsqrt %69 : vector<1x384xf32>
    %71 = arith.mulf %13, %70 : vector<1x384xf32>
    %72 = vector.broadcast %71 : vector<1x384xf32> to vector<8x384xf32>
    %73 = arith.mulf %56, %72 : vector<8x384xf32>
    %74 = arith.mulf %60, %71 : vector<1x384xf32>
    %75 = arith.subf %14, %74 : vector<1x384xf32>
    %76 = vector.broadcast %75 : vector<1x384xf32> to vector<8x384xf32>
    %77 = arith.addf %73, %76 : vector<8x384xf32>
    %78 = arith.truncf %50 : vector<8x512xf32> to vector<8x512xbf16>
    %cst_35 = arith.constant dense<0.000000e+00> : vector<8x384xf32>
    %79 = tpu.matmul %78, %5, %cst_35 {dimension_numbers = #tpu.dot_dimension_numbers<[1], [0], [0], [1], [0, 0, 1, 1], [], []>} : vector<8x512xbf16>, vector<512x384xbf16>, vector<8x384xf32> -> vector<8x384xf32>
    %80 = arith.truncf %1 : vector<8x4xf32> to vector<8x4xbf16>
    %cst_36 = arith.constant dense<0.000000e+00> : vector<8x384xf32>
    %81 = tpu.matmul %80, %3, %cst_36 {dimension_numbers = #tpu.dot_dimension_numbers<[1], [0], [0], [1], [0, 0, 1, 1], [], []>} : vector<8x4xbf16>, vector<4x384xbf16>, vector<8x384xf32> -> vector<8x384xf32>
    %82 = arith.addf %79, %81 : vector<8x384xf32>
    %83 = vector.broadcast %15 : vector<1x384xf32> to vector<8x384xf32>
    %84 = arith.addf %82, %83 : vector<8x384xf32>
    %cst_37 = arith.constant 0.000000e+00 : f32
    %85 = vector.broadcast %cst_37 : f32 to vector<8x384xf32>
    %86 = arith.maximumf %84, %85 : vector<8x384xf32>
    %87 = tpu.concatenate %77, %86 in 1 : vector<8x384xf32>, vector<8x384xf32> -> vector<8x768xf32>
    %88 = arith.truncf %87 : vector<8x768xf32> to vector<8x768xbf16>
    %cst_38 = arith.constant dense<0.000000e+00> : vector<8x5xf32>
    %89 = tpu.matmul %88, %6, %cst_38 {dimension_numbers = #tpu.dot_dimension_numbers<[1], [0], [0], [1], [0, 0, 1, 1], [], []>} : vector<8x768xbf16>, vector<768x5xbf16>, vector<8x5xf32> -> vector<8x5xf32>
    %90 = vector.broadcast %16 : vector<1x5xf32> to vector<8x5xf32>
    %91 = arith.addf %89, %90 : vector<8x5xf32>
    %cst_39 = arith.constant 0.000000e+00 : f32
    %92 = vector.broadcast %cst_39 : f32 to vector<8x128xf32>
    %c0_40 = arith.constant 0 : index
    %c0_41 = arith.constant 0 : index
    %93 = vector.load %arg7[%c0_40, %c0_41] : memref<8x128xf32, #tpu.memory_space<vmem>>, vector<8x128xf32>
    tpu.vector_store %arg7[%c0_40, %c0_41], %92 {strides = array<i32>} : memref<8x128xf32, #tpu.memory_space<vmem>>, vector<8x128xf32>,
    %94 = vector.extract_strided_slice %91 {offsets = [0, 0], sizes = [8, 4], strides = [1, 1]} : vector<8x5xf32> to vector<8x4xf32>
    %95 = math.tanh %94 : vector<8x4xf32>
    %c0_42 = arith.constant 0 : index
    %c0_43 = arith.constant 0 : index
    %96 = vector.load %arg7[%c0_42, %c0_43] : memref<8x128xf32, #tpu.memory_space<vmem>>, vector<8x4xf32>
    tpu.vector_store %arg7[%c0_42, %c0_43], %95 {strides = array<i32>} : memref<8x128xf32, #tpu.memory_space<vmem>>, vector<8x4xf32>,
    %97 = vector.extract_strided_slice %91 {offsets = [0, 4], sizes = [8, 1], strides = [1, 1]} : vector<8x5xf32> to vector<8x1xf32>
    %c0_44 = arith.constant 0 : index
    %c4_45 = arith.constant 4 : index
    %98 = vector.load %arg7[%c0_44, %c4_45] : memref<8x128xf32, #tpu.memory_space<vmem>>, vector<8x1xf32>
    tpu.vector_store %arg7[%c0_44, %c4_45], %97 {strides = array<i32>} : memref<8x128xf32, #tpu.memory_space<vmem>>, vector<8x1xf32>,
    return
  }
  func.func @transform_0(%arg0: i32) -> (i32, i32) {
    %c0_i32 = arith.constant 0 : i32
    %c0_i32_0 = arith.constant 0 : i32
    %c0_i32_1 = arith.constant 0 : i32
    return %c0_i32, %c0_i32_0 : i32, i32
  }
  func.func @transform_1(%arg0: i32) -> (i32, i32) {
    %c0_i32 = arith.constant 0 : i32
    %c0_i32_0 = arith.constant 0 : i32
    %c0_i32_1 = arith.constant 0 : i32
    return %c0_i32, %c0_i32_0 : i32, i32
  }
  func.func @transform_2(%arg0: i32) -> (i32, i32) {
    %c0_i32 = arith.constant 0 : i32
    %c0_i32_0 = arith.constant 0 : i32
    %c0_i32_1 = arith.constant 0 : i32
    return %c0_i32, %c0_i32_0 : i32, i32
  }
  func.func @transform_3(%arg0: i32) -> (i32, i32) {
    %c0_i32 = arith.constant 0 : i32
    %c0_i32_0 = arith.constant 0 : i32
    %c0_i32_1 = arith.constant 0 : i32
    return %c0_i32, %c0_i32_0 : i32, i32
  }
  func.func @transform_4(%arg0: i32) -> (i32, i32) {
    %c0_i32 = arith.constant 0 : i32
    %c0_i32_0 = arith.constant 0 : i32
    %c0_i32_1 = arith.constant 0 : i32
    return %c0_i32, %c0_i32_0 : i32, i32
  }
  func.func @transform_5(%arg0: i32) -> (i32, i32) {
    %c0_i32 = arith.constant 0 : i32
    %c0_i32_0 = arith.constant 0 : i32
    %c0_i32_1 = arith.constant 0 : i32
    return %c0_i32, %c0_i32_0 : i32, i32
  }
  func.func @transform_6(%arg0: i32) -> (i32, i32) {
    %c0_i32 = arith.constant 0 : i32
    %c0_i32_0 = arith.constant 0 : i32
    %c0_i32_1 = arith.constant 0 : i32
    return %c0_i32, %c0_i32_0 : i32, i32
  }
}

</mosaic_0001>

<bundles_post_ra>
// kernel: tpu_custom_call.1
= control target key start
LH: loop header
LB: loop body
LE: loop exit
PB: predicated region body
PF: predicated region fallthrough
CT: control target
= control target key end

     0   :  { %11 = vsyncpa [#allocation3], 0  ;;  %s4180_s0 = inlined_call_operand.vmem [shape: f32[8,16], index: 0, kind: input, shape index: {}]   ;;  %s4181_s1 = inlined_call_operand.vmem [shape: f32[8,4], index: 1, kind: input, shape index: {}]   ;;  %s4182_s2 = inlined_call_operand.vmem [shape: bf16[20,512], index: 2, kind: input, shape index: {}]   ;;  %s4183_s3 = inlined_call_operand.hbm [shape: bf16[512,768], index: 3, kind: input, shape index: {}]   ;;  %s4184_s4 = inlined_call_operand.vmem [shape: bf16[768,5], index: 4, kind: input, shape index: {}]   ;;  %s4185_s5 = inlined_call_operand.vmem [shape: f32[10,512], index: 5, kind: input, shape index: {}]   ;;  %s4186_s6 = inlined_call_operand.hbm [shape: f32[8,128], index: 6, kind: output, shape index: {}]  }
   0x1   :  { %12 = vsyncpa [#allocation4], 0  ;;  %s3720_s21 = smov [#allocation2]   ;;  %s3672_s25 = scalar_lea.hbm %s4183_s3, 24576 }
   0x2   :  { %s24_s22 = sshll.u32 %s3720_s21, 4  ;;  %p3673_p0 = scmp.ne.s32.totalorder %s4183_s3, %s3672_s25  ;;  %s25_s22 = int_to_ptr.vmem [resolvable:$true] %s24_s22 }
   0x3   :  { %p3676_p1 = scmp.lt.u32.totalorder %s3672_s25, %s4183_s3 }
   0x5   :  { %p3678_p2 = pnand %p3676_p1, %p3673_p0 }
   0x7   :  { %3681 = shalt.err (!%p3678_p2)
}
   0x8   :  { %s3682_s30 = scalar_lea.vmem %s25_s22, 24576  ;;  %p3687_p4 = scmp.lt.s32.totalorder %s25_s22, %s25_s22 }
   0x9   :  { %p3683_p3 = scmp.ne.s32.totalorder %s25_s22, %s3682_s30  ;;  %p3688_p5 = scmp.lt.s32.totalorder %s3682_s30, %s3682_s30 }
   0xb   :  { %p3689_p6 = por %p3688_p5, %p3687_p4 }
   0xd   :  { %p3690_p7 = pnand %p3689_p6, %p3683_p3 }
   0xf   :  { %3693 = shalt.err (!%p3690_p7)
}
  0x10   :  { %s3721_s7 = smov 384   ;;  %s3722_s8 = smov 24  }
  0x11   :  { %30 = dma.hbm_to_vmem [thread:$0]  %s4183_s3, 24576, %s25_s22, [#allocation3], %s3721_s7, %s3721_s7, %s3722_s8  }
  0x12   :  { %3716 = dma.done.wait [#allocation3], 24576  }
  0x13   :  { %3717 = vsyncadd [#allocation3], 4294942720  ;;  %v3723_v0 = vmov 0   ;;  %v3343_v1 = vld [vmem:[%s4182_s2 + $0x4] ss:$16 sps:$4 sm:$0xff]   ;;  %vm459_vm0 = vcmask 130048   ;;  %v419_v57 = vlaneseq }
  0x14   :  { %495 = vmatprep.mubr.bf16.mxu1 %v3723_v0  ;;  %v3345_v2 = vld [vmem:[%s4182_s2] ss:$16 sps:$4 sm:$0xff]   ;;  %463 = vmatprep.subr.bf16.mxu1 %v3343_v1  ;;  %v3348_v5 = vld [vmem:[%s4182_s2 + $0xc] ss:$16 sps:$4 sm:$0xff]   ;;  %v3346_v6 = vld [vmem:[%s4182_s2 + $0x8] ss:$16 sps:$4 sm:$0xff]  }
  0x15   :  { %v39_v3 = vld [vmem:[%s4180_s0] sm:$0xff]  ;;  %464 = vmatpush1.bf16.msra.mxu1 %v3345_v2  ;;  %v3352_v9 = vld [vmem:[#allocation2 + $0x34] ss:$24 sps:$4 sm:$0xff]   ;;  %v3354_v10 = vld [vmem:[#allocation2 + $0x30] ss:$24 sps:$4 sm:$0xff]   ;;  %v3792_v58 = vshrl.u32 %v419_v57, 7 }
  0x16   :  { %v417_v4 = vpack.c.bf16 %v39_v3, %v39_v3  ;;  %504 = vmatprep.subr.bf16.mxu1 %v3348_v5  ;;  %v3349_v7 = vld [vmem:[#allocation2 + $0x4] ss:$24 sps:$4 sm:$0xff]   ;;  %v3351_v8 = vld [vmem:[#allocation2] ss:$24 sps:$4 sm:$0xff]   ;;  %v3358_v13 = vld [vmem:[#allocation2 + $0x94] ss:$24 sps:$4 sm:$0xff]  }
  0x17   :  { %1353 = vmatprep.subr.bf16.mxu0 %v3349_v7  ;;  %v3355_v11 = vld [vmem:[#allocation2 + $0x64] ss:$24 sps:$4 sm:$0xff]   ;;  %v3357_v12 = vld [vmem:[#allocation2 + $0x60] ss:$24 sps:$4 sm:$0xff]   ;;  %v3360_v14 = vld [vmem:[#allocation2 + $0x90] ss:$24 sps:$4 sm:$0xff]  }
  0x18   :  { %2919 = vmatmul.mubr.msk.bf16.vlgmr.msra.gmra.mrb[0].mxu1 %vm459_vm0, %v417_v4  ;;  %1354 = vmatpush1.bf16.msra.mxu0 %v3351_v8  ;;  %v3361_v15 = vld [vmem:[#allocation2 + $0xc4] ss:$24 sps:$4 sm:$0xff]   ;;  %v3363_v16 = vld [vmem:[#allocation2 + $0xc0] ss:$24 sps:$4 sm:$0xff]   ;;  %v3364_v17 = vld [vmem:[#allocation2 + $0xf4] ss:$24 sps:$4 sm:$0xff]  }
  0x19   :  { %505 = vmatpush1.bf16.msra.mxu1 %v3346_v6  ;;  %536 = vmatprep.mubr.bf16.mxu1 %v3723_v0  ;;  %v3366_v18 = vld [vmem:[#allocation2 + $0xf0] ss:$24 sps:$4 sm:$0xff]   ;;  %v3367_v19 = vld [vmem:[#allocation2 + $0x124] ss:$24 sps:$4 sm:$0xff]   ;;  %v3369_v20 = vld [vmem:[#allocation2 + $0x120] ss:$24 sps:$4 sm:$0xff]  }
  0x1a   :  { %1355 = vmatprep.subr.bf16.mxu0 %v3352_v9  ;;  %v3370_v21 = vld [vmem:[#allocation2 + $0x154] ss:$24 sps:$4 sm:$0xff]   ;;  %v3375_v22 = vld [vmem:[#allocation2 + $0x188] ss:$24 sps:$4 sm:$0xff]   ;;  %v3380_v25 = vld [vmem:[#allocation2 + $0x1b8] ss:$24 sps:$4 sm:$0xff]  }
  0x1b   :  { %v3372_v23 = vld [vmem:[#allocation2 + $0x150] ss:$24 sps:$4 sm:$0xff]   ;;  %v3373_v26 = vld [vmem:[#allocation2 + $0x184] ss:$24 sps:$4 sm:$0xff]   ;;  %3167 = vmatprep.subr.bf16.mxu1 %v3375_v22  ;;  %v3376_v29 = vld [vmem:[#allocation2 + $0x180] ss:$24 sps:$4 sm:$0xff]  }
  0x1c   :  { %1356 = vmatpush1.bf16.msra.mxu0 %v3354_v10  ;;  %v3377_v24 = vld [vmem:[#allocation2 + $0x8] ss:$24 sps:$4 sm:$0xff]   ;;  %v3382_v27 = vld [vmem:[#allocation2 + $0x38] ss:$24 sps:$4 sm:$0xff]   ;;  %v3378_v30 = vld [vmem:[#allocation2 + $0x1b4] ss:$24 sps:$4 sm:$0xff]  }
  0x1d   :  { %1357 = vmatprep.subr.bf16.mxu0 %v3355_v11  ;;  %v3385_v28 = vld [vmem:[#allocation2 + $0x1e8] ss:$24 sps:$4 sm:$0xff]   ;;  %v3390_v32 = vld [vmem:[#allocation2 + $0x218] ss:$24 sps:$4 sm:$0xff]   ;;  %v3383_v34 = vld [vmem:[#allocation2 + $0x1e4] ss:$24 sps:$4 sm:$0xff]  }
  0x1e   :  { %v3387_v31 = vld [vmem:[#allocation2 + $0x68] ss:$24 sps:$4 sm:$0xff]   ;;  %v3392_v35 = vld [vmem:[#allocation2 + $0x98] ss:$24 sps:$4 sm:$0xff]   ;;  %v3388_v38 = vld [vmem:[#allocation2 + $0x214] ss:$24 sps:$4 sm:$0xff]  }
  0x1f   :  { %v3381_v33 = vld [vmem:[#allocation2 + $0x1b0] ss:$24 sps:$4 sm:$0xff]   ;;  %v3386_v37 = vld [vmem:[#allocation2 + $0x1e0] ss:$24 sps:$4 sm:$0xff]   ;;  %v3393_v42 = vld [vmem:[#allocation2 + $0x244] ss:$24 sps:$4 sm:$0xff]  }
  0x20   :  { %2920 = vmatmul.mubr.msk.bf16.vlgmr.msra.gmra.mrb[4].mxu1 %vm459_vm0, %v417_v4  ;;  %1358 = vmatpush1.bf16.msra.mxu0 %v3357_v12  ;;  %v3395_v36 = vld [vmem:[#allocation2 + $0x248] ss:$24 sps:$4 sm:$0xff]   ;;  %v3400_v40 = vld [vmem:[#allocation2 + $0x278] ss:$24 sps:$4 sm:$0xff]   ;;  %v3398_v46 = vld [vmem:[#allocation2 + $0x274] ss:$24 sps:$4 sm:$0xff]  }
  0x21   :  { %1359 = vmatprep.subr.bf16.mxu0 %v3358_v13  ;;  %3168 = vmatpush3.bf16.msra.mxu1 %v3377_v24  ;;  %v3397_v39 = vld [vmem:[#allocation2 + $0xc8] ss:$24 sps:$4 sm:$0xff]   ;;  %v3402_v43 = vld [vmem:[#allocation2 + $0xf8] ss:$24 sps:$4 sm:$0xff]   ;;  %v3403_v50 = vld [vmem:[#allocation2 + $0x2a4] ss:$24 sps:$4 sm:$0xff]  }
  0x22   :  { %3169 = vmatprep.subr.bf16.mxu1 %v3380_v25  ;;  %v3391_v41 = vld [vmem:[#allocation2 + $0x210] ss:$24 sps:$4 sm:$0xff]   ;;  %v3396_v45 = vld [vmem:[#allocation2 + $0x240] ss:$24 sps:$4 sm:$0xff]   ;;  %v3408_v53 = vld [vmem:[#allocation2 + $0x2d4] ss:$24 sps:$4 sm:$0xff]  }
  0x23   :  { %v3405_v44 = vld [vmem:[#allocation2 + $0x2a8] ss:$24 sps:$4 sm:$0xff]   ;;  %v3410_v48 = vld [vmem:[#allocation2 + $0x2d8] ss:$24 sps:$4 sm:$0xff]   ;;  %v3415_v55 = vld [vmem:[#allocation2 + $0x304] ss:$24 sps:$4 sm:$0xff]  }
  0x24   :  { %1360 = vmatpush1.bf16.msra.mxu0 %v3360_v14  ;;  %v3407_v47 = vld [vmem:[#allocation2 + $0x128] ss:$24 sps:$4 sm:$0xff]   ;;  %v3412_v51 = vld [vmem:[#allocation2 + $0x158] ss:$24 sps:$4 sm:$0xff]   ;;  %v3795_v59 = vsub.s32 0, %v3792_v58  ;;  %v3801_v61 = vsub.s32 1, %v3792_v58 }
  0x25   :  { %1361 = vmatprep.subr.bf16.mxu0 %v3361_v15  ;;  %3170 = vmatpush3.bf16.msra.mxu1 %v3382_v27  ;;  %v3401_v49 = vld [vmem:[#allocation2 + $0x270] ss:$24 sps:$4 sm:$0xff]   ;;  %v3406_v52 = vld [vmem:[#allocation2 + $0x2a0] ss:$24 sps:$4 sm:$0xff]   ;;  %v3806_v4 = vsub.s32 2, %v3792_v58  ;;  %v3809_v7 = vsub.s32 3, %v3792_v58 }
  0x26   :  { %3171 = vmatprep.subr.bf16.mxu1 %v3385_v28  ;;  %v3411_v54 = vld [vmem:[#allocation2 + $0x2d0] ss:$24 sps:$4 sm:$0xff]   ;;  %v3724_v11 = vmov 0.0   ;;  %vm1686_vm1 = vcmask 1041408   ;;  %vm1682_vm2 = vcmask 31744   ;;  %vm3726_vm3 = vmmov 0  }
  0x27   :  { %v3416_v56 = vld [vmem:[#allocation2 + $0x488] ss:$24 sps:$4 sm:$0xff]   ;;  %2887 = vst [vmem:[#allocation5] sm:$0xff] %v3724_v11  ;;  %s3727_s28 = smov [#allocation5]   ;;  %vm2890_vm4 = vcmask 39968  }
  0x28   :  { %1362 = vmatpush1.bf16.msra.mxu0 %v3363_v16  ;;  %v399_v60 = vld [vmem:[%s4185_s5] ss:$8 sm:$0xf]  ;;  %s2898_s29 = sshll.u32 %s3727_s28, 4  ;;  %s2899_s29 = int_to_ptr.vmem [resolvable:$true] %s2898_s29 }
  0x29   :  { %1363 = vmatprep.subr.bf16.mxu0 %v3364_v17  ;;  %3172 = vmatpush3.bf16.msra.mxu1 %v3387_v31  ;;  %v422_v62 = vrot.slane %v399_v60, %v3795_v59  ;;  %v426_v63 = vrot.slane %v399_v60, %v3801_v61  ;;  %v430_v13 = vrot.slane %v399_v60, %v3806_v4  ;;  %p3699_p9 = scmp.lt.s32.totalorder %s2899_s29, %s2899_s29 }
  0x2a   :  { %3173 = vmatprep.subr.bf16.mxu1 %v3390_v32  ;;  %v434_v15 = vrot.slane %v399_v60, %v3809_v7 }
  0x2c   :  { %1364 = vmatpush1.bf16.msra.mxu0 %v3366_v18 }
  0x2d   :  { %1365 = vmatprep.subr.bf16.mxu0 %v3367_v19  ;;  %3174 = vmatpush3.bf16.msra.mxu1 %v3392_v35 }
  0x2e   :  { %3175 = vmatprep.subr.bf16.mxu1 %v3395_v36 }
  0x30   :  { %1366 = vmatpush1.bf16.msra.mxu0 %v3369_v20 }
  0x31   :  { %1367 = vmatprep.subr.bf16.mxu0 %v3370_v21  ;;  %3176 = vmatpush3.bf16.msra.mxu1 %v3397_v39 }
  0x32   :  { %3177 = vmatprep.subr.bf16.mxu1 %v3400_v40 }
  0x34   :  { %1368 = vmatpush1.bf16.msra.mxu0 %v3372_v23 }
  0x35   :  { %1369 = vmatprep.subr.bf16.mxu0 %v3373_v26  ;;  %3178 = vmatpush3.bf16.msra.mxu1 %v3402_v43 }
  0x36   :  { %3179 = vmatprep.subr.bf16.mxu1 %v3405_v44 }
  0x38   :  { %1370 = vmatpush1.bf16.msra.mxu0 %v3376_v29 }
  0x39   :  { %1371 = vmatprep.subr.bf16.mxu0 %v3378_v30  ;;  %3180 = vmatpush3.bf16.msra.mxu1 %v3407_v47 }
  0x3a   :  { %3181 = vmatprep.subr.bf16.mxu1 %v3410_v48 }
  0x3c   :  { %1372 = vmatpush1.bf16.msra.mxu0 %v3381_v33 }
  0x3d   :  { %1373 = vmatprep.subr.bf16.mxu0 %v3383_v34  ;;  %3182 = vmatpush3.bf16.msra.mxu1 %v3412_v51 }
  0x3e   :  { %3189 = vmatprep.subr.bf16.mxu1 %v3416_v56 }
  0x40   :  { %1374 = vmatpush1.bf16.msra.mxu0 %v3386_v37 }
  0x41   :  { %1375 = vmatprep.subr.bf16.mxu0 %v3388_v38 }
  0x44   :  { %1376 = vmatpush1.bf16.msra.mxu0 %v3391_v41 }
  0x45   :  { %1377 = vmatprep.subr.bf16.mxu0 %v3393_v42 }
  0x48   :  { %1378 = vmatpush1.bf16.msra.mxu0 %v3396_v45 }
  0x49   :  { %1379 = vmatprep.subr.bf16.mxu0 %v3398_v46 }
  0x4c   :  { %1380 = vmatpush1.bf16.msra.mxu0 %v3401_v49 }
  0x4d   :  { %1381 = vmatprep.subr.bf16.mxu0 %v3403_v50 }
  0x50   :  { %1382 = vmatpush1.bf16.msra.mxu0 %v3406_v52 }
  0x51   :  { %1383 = vmatprep.subr.bf16.mxu0 %v3408_v53 }
  0x54   :  { %1384 = vmatpush1.bf16.msra.mxu0 %v3411_v54 }
  0x55   :  { %1394 = vmatprep.subr.bf16.mxu0 %v3415_v55 }
  0xeb   :  { %v497_v1 = vpop.f32.mrb[0].mxu1 }
  0xec   :  { %v498_v2 = vadd.f32 %v497_v1, %v422_v62  ;;  %v499_v3 = vpop.f32.mrb[1].mxu1 }
  0xed   :  { %v500_v5 = vadd.f32 %v499_v3, %v426_v63  ;;  %v501_v6 = vpop.f32.mrb[2].mxu1 }
  0xee   :  { %v3811_v8 = vmax.f32 %v498_v2, 0.0  ;;  %v502_v9 = vpop.f32.mrb[3].mxu1 }
  0xef   :  { %v3813_v10 = vmax.f32 %v500_v5, 0.0 }
  0xf0   :  { %v549_v12 = vrot.slane %v3811_v8, 4 }
  0xf1   :  { %v555_v14 = vrot.slane %v3813_v10, 4 }
  0xf2   :  { %v550_v16 = vadd.f32 %v549_v12, %v3811_v8 }
  0xf3   :  { %v556_v17 = vadd.f32 %v555_v14, %v3813_v10  ;;  %v538_v18 = vpop.f32.mrb[4].mxu1 }
  0xf4   :  { %v551_v19 = vrot.slane %v550_v16, 2  ;;  %v539_v20 = vadd.f32 %v538_v18, %v430_v13  ;;  %v540_v21 = vpop.f32.mrb[5].mxu1 }
  0xf5   :  { %v557_v22 = vrot.slane %v556_v17, 2  ;;  %v541_v23 = vadd.f32 %v540_v21, %v434_v15  ;;  %v542_v24 = vpop.f32.mrb[6].mxu1 }
  0xf6   :  { %v552_v25 = vadd.f32 %v551_v19, %v550_v16  ;;  %v3822_v26 = vmax.f32 %v539_v20, 0.0  ;;  %v543_v27 = vpop.f32.mrb[7].mxu1 }
  0xf7   :  { %v3824_v28 = vmax.f32 %v541_v23, 0.0  ;;  %v558_v29 = vadd.f32 %v557_v22, %v556_v17 }
  0xf8   :  { %v553_v30 = vrot.slane %v552_v25, 1  ;;  %v561_v31 = vrot.slane %v3822_v26, 4 }
  0xf9   :  { %v567_v32 = vrot.slane %v3824_v28, 4  ;;  %v559_v33 = vrot.slane %v558_v29, 1 }
  0xfa   :  { %v554_v34 = vadd.f32 %v553_v30, %v552_v25  ;;  %v562_v35 = vadd.f32 %v561_v31, %v3822_v26 }
  0xfb   :  { %v568_v36 = vadd.f32 %v567_v32, %v3824_v28  ;;  %v560_v37 = vadd.f32 %v559_v33, %v558_v29 }
  0xfc   :  { %v3830_v38 = vmul.f32 0.125, %v554_v34  ;;  %v563_v39 = vrot.slane %v562_v35, 2 }
  0xfd   :  { %v569_v40 = vrot.slane %v568_v36, 2  ;;  %v3832_v41 = vmul.f32 0.125, %v560_v37  ;;  %v3725_v37 = vmov 1966171168  }
  0xfe   :  { %v578_v42 = vsub.f32 %v3811_v8, %v3830_v38  ;;  %v564_v43 = vadd.f32 %v563_v39, %v562_v35  ;;  %v629_v39 = vunpack.c.l.s4 %v3725_v37 }
  0xff   :  { %v570_v44 = vadd.f32 %v569_v40, %v568_v36  ;;  %v579_v45 = vsub.f32 %v3813_v10, %v3832_v41 }
 0x100   :  { %v582_v46 = vmul.f32 %v578_v42, %v578_v42  ;;  %v565_v47 = vrot.slane %v564_v43, 1  ;;  %v630_v42 = vunpack.c.0.s8 %v629_v39 }
 0x101   :  { %v571_v48 = vrot.slane %v570_v44, 1  ;;  %v583_v49 = vmul.f32 %v579_v45, %v579_v45 }
 0x102   :  { %v586_v50 = vrot.slane %v582_v46, 4  ;;  %v566_v51 = vadd.f32 %v565_v47, %v564_v43  ;;  %v3847_v45 = vsub.s32 %v630_v42, %v3792_v58 }
 0x103   :  { %v572_v52 = vadd.f32 %v571_v48, %v570_v44  ;;  %v592_v53 = vrot.slane %v583_v49, 4 }
 0x104   :  { %v587_v54 = vadd.f32 %v586_v50, %v582_v46  ;;  %v3838_v55 = vmul.f32 0.125, %v566_v51 }
 0x105   :  { %v3840_v56 = vmul.f32 0.125, %v572_v52  ;;  %v593_v57 = vadd.f32 %v592_v53, %v583_v49  ;;  %v2907_v52 = vld [vmem:[%s4185_s5 + $0x1] ss:$8 sm:$0xf] }
 0x106   :  { %v588_v60 = vrot.slane %v587_v54, 2  ;;  %v580_v62 = vsub.f32 %v3822_v26, %v3838_v55  ;;  %v2909_v53 = vld [vmem:[%s4185_s5 + $0x3] ss:$8 sm:$0xf] }
 0x107   :  { %v581_v63 = vsub.f32 %v3824_v28, %v3840_v56  ;;  %v594_v1 = vrot.slane %v593_v57, 2 }
 0x108   :  { %v589_v2 = vadd.f32 %v588_v60, %v587_v54  ;;  %v584_v3 = vmul.f32 %v580_v62, %v580_v62 }
 0x109   :  { %v585_v5 = vmul.f32 %v581_v63, %v581_v63  ;;  %v595_v6 = vadd.f32 %v594_v1, %v593_v57 }
 0x10a   :  { %v590_v9 = vrot.slane %v589_v2, 1  ;;  %v598_v12 = vrot.slane %v584_v3, 4 }
 0x10b   :  { %v604_v13 = vrot.slane %v585_v5, 4  ;;  %v596_v14 = vrot.slane %v595_v6, 1 }
 0x10c   :  { %v591_v15 = vadd.f32 %v590_v9, %v589_v2  ;;  %v599_v16 = vadd.f32 %v598_v12, %v584_v3 }
 0x10d   :  { %v605_v17 = vadd.f32 %v604_v13, %v585_v5  ;;  %v597_v18 = vadd.f32 %v596_v14, %v595_v6 }
 0x10e   :  { %v610_v19 = vmul.f32 0.125, %v591_v15  ;;  %v600_v20 = vrot.slane %v599_v16, 2 }
 0x10f   :  { %v606_v21 = vrot.slane %v605_v17, 2  ;;  %v611_v22 = vmul.f32 0.125, %v597_v18 }
 0x110   :  { %v601_v23 = vadd.f32 %v600_v20, %v599_v16  ;;  %v614_v25 = vadd.f32 1e-05, %v610_v19 }
 0x111   :  { %v607_v24 = vadd.f32 %v606_v21, %v605_v17  ;;  %v615_v30 = vadd.f32 1e-05, %v611_v22 }
 0x112   :  { %v602_v27 = vrot.slane %v601_v23, 1  ;;  %3656 = vrsqrt.f32 %v614_v25 }
 0x113   :  { %v608_v29 = vrot.slane %v607_v24, 1  ;;  %3658 = vrsqrt.f32 %v615_v30 }
 0x114   :  { %v603_v31 = vadd.f32 %v602_v27, %v601_v23 }
 0x115   :  { %v609_v32 = vadd.f32 %v608_v29, %v607_v24 }
 0x116   :  { %v612_v33 = vmul.f32 0.125, %v603_v31 }
 0x117   :  { %v613_v34 = vmul.f32 0.125, %v609_v32 }
 0x118   :  { %v616_v35 = vadd.f32 1e-05, %v612_v33 }
 0x119   :  { %v617_v36 = vadd.f32 1e-05, %v613_v34 }
 0x11a   :  { %3660 = vrsqrt.f32 %v616_v35 }
 0x11b   :  { %3662 = vrsqrt.f32 %v617_v36 }
 0x11c   :  { %v3657_v40 = vpop.eup %3656 }
 0x11d   :  { %v3659_v43 = vpop.eup %3658 }
 0x11e   :  { %v626_v46 = vcombine.low %v3657_v40, %v3659_v43 }
 0x120   :  { %v634_v49 = vrot.slane %v626_v46, %v3847_v45 }
 0x124   :  { %v3661_v44 = vpop.eup %3660 }
 0x125   :  { %v3663_v47 = vpop.eup %3662 }
 0x126   :  { %v627_v48 = vcombine.low %v3661_v44, %v3663_v47 }
 0x128   :  { %v641_v50 = vrot.slane %v627_v48, %v3847_v45 }
 0x12a   :  { %v642_v51 = vcombine.low %v634_v49, %v641_v50 }
 0x12c   :  { %v649_v54 = vrot.slane %v642_v51, %v3847_v45 }
 0x12e   :  { %v651_v58 = vmul.f32 %v2907_v52, %v649_v54  ;;  %v652_v57 = vmul.f32 %v2909_v53, %v649_v54 }
 0x130   :  { %v657_v60 = vrot.slane %v651_v58, %v3795_v59  ;;  %v661_v62 = vrot.slane %v651_v58, %v3801_v61  ;;  %v665_v63 = vrot.slane %v651_v58, %v3806_v4  ;;  %v669_v1 = vrot.slane %v651_v58, %v3809_v7  ;;  %v3413_v58 = vld [vmem:[#allocation2 + $0x300] ss:$24 sps:$4 sm:$0xff]  }
 0x131   :  { %v741_v2 = vrot.slane %v652_v57, %v3795_v59  ;;  %v745_v3 = vrot.slane %v652_v57, %v3801_v61  ;;  %v749_v5 = vrot.slane %v652_v57, %v3806_v4  ;;  %v753_v6 = vrot.slane %v652_v57, %v3809_v7 }
 0x132   :  { %v678_v9 = vmul.f32 %v657_v60, %v3830_v38  ;;  %v679_v12 = vmul.f32 %v661_v62, %v3832_v41  ;;  %v680_v13 = vmul.f32 %v665_v63, %v3838_v55  ;;  %v681_v14 = vmul.f32 %v669_v1, %v3840_v56 }
 0x133   :  { %v677_v15 = vmul.f32 %v669_v1, %v3824_v28  ;;  %v676_v16 = vmul.f32 %v665_v63, %v3822_v26  ;;  %v762_v18 = vmul.f32 %v741_v2, %v3830_v38  ;;  %v763_v19 = vmul.f32 %v745_v3, %v3832_v41  ;;  %v3420_v1 = vld [vmem:[#allocation2 + $0x334] ss:$24 sps:$4 sm:$0xff]  }
 0x134   :  { %v686_v17 = vcombine.low %v678_v9, %v679_v12  ;;  %v687_v20 = vcombine.low %v680_v13, %v681_v14  ;;  %v764_v21 = vmul.f32 %v749_v5, %v3838_v55  ;;  %v765_v22 = vmul.f32 %v753_v6, %v3840_v56  ;;  %v2908_v55 = vld [vmem:[%s4185_s5 + $0x2] ss:$8 sm:$0xf]  ;;  %v3430_v14 = vld [vmem:[#allocation2 + $0x394] ss:$24 sps:$4 sm:$0xff]  }
 0x135   :  { %v761_v23 = vmul.f32 %v753_v6, %v3824_v28  ;;  %v770_v25 = vcombine.low %v762_v18, %v763_v19  ;;  %v760_v27 = vmul.f32 %v749_v5, %v3822_v26  ;;  %v2910_v26 = vld [vmem:[%s4185_s5 + $0x4] ss:$8 sm:$0xf]  ;;  %v675_v34 = vmul.f32 %v661_v62, %v3813_v10  ;;  %v3422_v5 = vld [vmem:[#allocation2 + $0x338] ss:$24 sps:$4 sm:$0xff]  }
 0x136   :  { %v694_v24 = vrot.slane %v686_v17, %v3847_v45  ;;  %v701_v29 = vrot.slane %v687_v20, %v3847_v45  ;;  %v771_v30 = vcombine.low %v764_v21, %v765_v22  ;;  %v674_v35 = vmul.f32 %v657_v60, %v3811_v8  ;;  %v3425_v6 = vld [vmem:[#allocation2 + $0x364] ss:$24 sps:$4 sm:$0xff]   ;;  %v3426_v9 = vld [vmem:[#allocation2 + $0x4e8] ss:$24 sps:$4 sm:$0xff]   ;;  %v3432_v17 = vld [vmem:[#allocation2 + $0x398] ss:$24 sps:$4 sm:$0xff]  }
 0x137   :  { %v778_v31 = vrot.slane %v770_v25, %v3847_v45  ;;  %v759_v42 = vmul.f32 %v745_v3, %v3813_v10  ;;  %v758_v44 = vmul.f32 %v741_v2, %v3811_v8  ;;  %v3417_v10 = vld [vmem:[#allocation2 + $0x308] ss:$24 sps:$4 sm:$0xff]   ;;  %v3435_v18 = vld [vmem:[#allocation2 + $0x3c4] ss:$24 sps:$4 sm:$0xff]   ;;  %v3440_v22 = vld [vmem:[#allocation2 + $0x3f4] ss:$24 sps:$4 sm:$0xff]  }
 0x138   :  { %v702_v38 = vcombine.low %v694_v24, %v701_v29  ;;  %v785_v41 = vrot.slane %v771_v30, %v3847_v45  ;;  %v3418_v3 = vld [vmem:[#allocation2 + $0x330] ss:$24 sps:$4 sm:$0xff]   ;;  %v3423_v12 = vld [vmem:[#allocation2 + $0x360] ss:$24 sps:$4 sm:$0xff]  }
 0x139   :  { %v3427_v13 = vld [vmem:[#allocation2 + $0x368] ss:$24 sps:$4 sm:$0xff]   ;;  %v3442_v25 = vld [vmem:[#allocation2 + $0x3f8] ss:$24 sps:$4 sm:$0xff]  }
 0x13a   :  { %v709_v56 = vrot.slane %v702_v38, %v3847_v45  ;;  %v786_v28 = vcombine.low %v778_v31, %v785_v41  ;;  %v3436_v19 = vld [vmem:[#allocation2 + $0x548] ss:$24 sps:$4 sm:$0xff]   ;;  %v3450_v38 = vld [vmem:[#allocation2 + $0x454] ss:$24 sps:$4 sm:$0xff]   ;;  %v3451_v41 = vld [vmem:[#allocation2 + $0x5d8] ss:$24 sps:$4 sm:$0xff]  }
 0x13b   :  { %v3433_v20 = vld [vmem:[#allocation2 + $0x3c0] ss:$24 sps:$4 sm:$0xff]   ;;  %v3438_v24 = vld [vmem:[#allocation2 + $0x3f0] ss:$24 sps:$4 sm:$0xff]  }
 0x13c   :  { %v711_v32 = vsub.f32 %v2908_v55, %v709_v56  ;;  %v793_v33 = vrot.slane %v786_v28, %v3847_v45  ;;  %v3437_v21 = vld [vmem:[#allocation2 + $0x3c8] ss:$24 sps:$4 sm:$0xff]   ;;  %v3452_v28 = vld [vmem:[#allocation2 + $0x458] ss:$24 sps:$4 sm:$0xff]  }
 0x13d   :  { %v3446_v29 = vld [vmem:[#allocation2 + $0x5a8] ss:$24 sps:$4 sm:$0xff]  }
 0x13e   :  { %v720_v36 = vrot.slane %v711_v32, %v3801_v61  ;;  %v716_v37 = vrot.slane %v711_v32, %v3795_v59  ;;  %v728_v39 = vrot.slane %v711_v32, %v3809_v7  ;;  %v724_v40 = vrot.slane %v711_v32, %v3806_v4  ;;  %v3443_v30 = vld [vmem:[#allocation2 + $0x420] ss:$24 sps:$4 sm:$0xff]   ;;  %v3448_v56 = vld [vmem:[#allocation2 + $0x450] ss:$24 sps:$4 sm:$0xff]   ;;  %v3455_v32 = vld [vmem:[#allocation2 + $0x484] ss:$24 sps:$4 sm:$0xff]  }
 0x13f   :  { %v795_v43 = vsub.f32 %v2910_v26, %v793_v33  ;;  %v3447_v31 = vld [vmem:[#allocation2 + $0x428] ss:$24 sps:$4 sm:$0xff]  }
 0x140   :  { %v734_v46 = vadd.f32 %v720_v36, %v675_v34  ;;  %v733_v47 = vadd.f32 %v716_v37, %v674_v35  ;;  %v736_v48 = vadd.f32 %v728_v39, %v677_v15  ;;  %v3898_v49 = vadd.f32 %v724_v40, %v676_v16  ;;  %v3431_v15 = vld [vmem:[#allocation2 + $0x518] ss:$24 sps:$4 sm:$0xff]   ;;  %v45_v55 = vld [vmem:[%s4182_s2 + $0x20] sm:$0x33]  ;;  %v3460_v37 = vld [vmem:[#allocation2 + $0x4b4] ss:$24 sps:$4 sm:$0xff]  }
 0x141   :  { %v804_v50 = vrot.slane %v795_v43, %v3801_v61  ;;  %v812_v51 = vrot.slane %v795_v43, %v3809_v7  ;;  %v800_v52 = vrot.slane %v795_v43, %v3795_v59  ;;  %v808_v53 = vrot.slane %v795_v43, %v3806_v4  ;;  %v3421_v7 = vld [vmem:[#allocation2 + $0x4b8] ss:$24 sps:$4 sm:$0xff]   ;;  %v40_v40 = vld [vmem:[%s4181_s1] sm:$0xff]  ;;  %v3464_v43 = vld [vmem:[%s4182_s2 + $0x28] ss:$0 sps:$4 sm:$0x33]  }
 0x142   :  { %v822_v54 = vpack.c.bf16 %v734_v46, %v734_v46  ;;  %v821_v57 = vpack.c.bf16 %v733_v47, %v733_v47  ;;  %v824_v2 = vpack.c.bf16 %v736_v48, %v736_v48  ;;  %v3428_v16 = vld [vmem:[#allocation2 + $0x390] ss:$24 sps:$4 sm:$0xff]   ;;  %v3018_v26 = vcombine.high %v45_v55, %v45_v55  ;;  %v3453_v34 = vld [vmem:[#allocation2 + $0x480] ss:$24 sps:$4 sm:$0xff]   ;;  %v3467_v48 = vld [vmem:[#allocation2 + $0x514] ss:$24 sps:$4 sm:$0xff]  }
 0x143   :  { %v3904_v60 = vadd.f32 %v804_v50, %v759_v42  ;;  %v3906_v8 = vadd.f32 %v812_v51, %v761_v23  ;;  %v3908_v62 = vadd.f32 %v800_v52, %v758_v44  ;;  %v3910_v63 = vadd.f32 %v808_v53, %v760_v27  ;;  %v3441_v23 = vld [vmem:[#allocation2 + $0x578] ss:$24 sps:$4 sm:$0xff]   ;;  %v3445_v27 = vld [vmem:[#allocation2 + $0x424] ss:$24 sps:$4 sm:$0xff]  }
 0x144   :  { %1385 = vmatprep.mubr.bf16.mxu0 %v822_v54  ;;  %1467 = vmatprep.mubr.bf16.mxu1 %v822_v54  ;;  %v3017_v33 = vcombine.low %v45_v55, %v45_v55  ;;  %v3917_v35 = vpack.c.bf16 %v3898_v49, %v3898_v49  ;;  %v3458_v39 = vld [vmem:[#allocation2 + $0x4b0] ss:$24 sps:$4 sm:$0xff]   ;;  %v3463_v42 = vld [vmem:[#allocation2 + $0x4e4] ss:$24 sps:$4 sm:$0xff]   ;;  %v1673_v44 = vpack.c.bf16 %v40_v40, %v40_v40  ;;  %v3461_v46 = vld [vmem:[#allocation2 + $0x4e0] ss:$24 sps:$4 sm:$0xff]  }
 0x145   :  { %1386 = vmatmul.mubr.bf16.vlgmr.msra.gmra.mrb[0].mxu0 %v821_v57  ;;  %1468 = vmatmul.mubr.bf16.vlgmr.msra.gmra.mrb[8].mxu1 %v821_v57  ;;  %v1694_v47 = vsel %vm1686_vm1, %v3464_v43, 0  ;;  %v3470_v49 = vld [vmem:[#allocation2 + $0x10] ss:$24 sps:$4 sm:$0xff]   ;;  %v3473_v50 = vld [vmem:[#allocation2 + $0x544] ss:$24 sps:$4 sm:$0xff]  }
 0x146   :  { %1395 = vmatpush1.bf16.msra.mxu0 %v3413_v58  ;;  %3190 = vmatpush3.bf16.msra.mxu1 %v3417_v10  ;;  %v1688_v36 = vsel %vm1686_vm1, %v3017_v33, 0  ;;  %v3468_v51 = vld [vmem:[#allocation2 + $0xc] ss:$24 sps:$4 sm:$0xff]   ;;  %v3471_v52 = vld [vmem:[#allocation2 + $0x540] ss:$24 sps:$4 sm:$0xff]   ;;  %v3936_v58 = vpack.c.bf16 %v3904_v60, %v3904_v60 }
 0x147   :  { %1426 = vmatprep.mubr.bf16.mxu0 %v824_v2  ;;  %1507 = vmatprep.mubr.bf16.mxu1 %v824_v2  ;;  %v3476_v53 = vld [vmem:[#allocation2 + $0x40] ss:$24 sps:$4 sm:$0xff]   ;;  %v3479_v54 = vld [vmem:[#allocation2 + $0x574] ss:$24 sps:$4 sm:$0xff]   ;;  %v3477_v10 = vld [vmem:[#allocation2 + $0x570] ss:$24 sps:$4 sm:$0xff]  }
 0x148   :  { %1396 = vmatprep.subr.bf16.mxu0 %v3420_v1  ;;  %3191 = vmatprep.subr.bf16.mxu1 %v3421_v7  ;;  %v3474_v57 = vld [vmem:[#allocation2 + $0x3c] ss:$24 sps:$4 sm:$0xff]   ;;  %v3480_v7 = vld [vmem:[#allocation2 + $0x6c] ss:$24 sps:$4 sm:$0xff]   ;;  %v3483_v2 = vld [vmem:[#allocation2 + $0x5a0] ss:$24 sps:$4 sm:$0xff]  }
 0x149   :  { %v3485_v1 = vld [vmem:[#allocation2 + $0x5a4] ss:$24 sps:$4 sm:$0xff]   ;;  %v3527_v55 = vld [vmem:[#allocation2 + $0x400] ss:$24 sps:$4 sm:$0xff]   ;;  %v3542_v40 = vld [vmem:[#allocation2 + $0x250] ss:$24 sps:$4 sm:$0xff]  }
 0x14a   :  { %1397 = vmatpush1.bf16.msra.mxu0 %v3418_v3  ;;  %3192 = vmatpush3.bf16.msra.mxu1 %v3422_v5  ;;  %v3488_v3 = vld [vmem:[#allocation2 + $0xa0] ss:$24 sps:$4 sm:$0xff]   ;;  %v3491_v5 = vld [vmem:[#allocation2 + $0x5d4] ss:$24 sps:$4 sm:$0xff]  }
 0x14b   :  { %1398 = vmatprep.subr.bf16.mxu0 %v3425_v6  ;;  %3193 = vmatprep.subr.bf16.mxu1 %v3426_v9  ;;  %v3486_v60 = vld [vmem:[#allocation2 + $0x9c] ss:$24 sps:$4 sm:$0xff]   ;;  %v3489_v6 = vld [vmem:[#allocation2 + $0x5d0] ss:$24 sps:$4 sm:$0xff]   ;;  %v3528_v33 = vld [vmem:[#allocation2 + $0x1ec] ss:$24 sps:$4 sm:$0xff]  }
 0x14c   :  { %v3494_v9 = vld [vmem:[#allocation2 + $0xd0] ss:$24 sps:$4 sm:$0xff]   ;;  %v3540_v43 = vld [vmem:[#allocation2 + $0x24c] ss:$24 sps:$4 sm:$0xff]  }
 0x14e   :  { %1399 = vmatpush1.bf16.msra.mxu0 %v3423_v12  ;;  %3194 = vmatpush3.bf16.msra.mxu1 %v3427_v13  ;;  %v3497_v12 = vld [vmem:[#allocation2 + $0x310] ss:$24 sps:$4 sm:$0xff]   ;;  %v3492_v13 = vld [vmem:[#allocation2 + $0xcc] ss:$24 sps:$4 sm:$0xff]  }
 0x14f   :  { %1400 = vmatprep.subr.bf16.mxu0 %v3430_v14  ;;  %3195 = vmatprep.subr.bf16.mxu1 %v3431_v15  ;;  %v3495_v14 = vld [vmem:[#allocation2 + $0x30c] ss:$24 sps:$4 sm:$0xff]   ;;  %v3500_v15 = vld [vmem:[#allocation2 + $0x100] ss:$24 sps:$4 sm:$0xff]  }
 0x152   :  { %1401 = vmatpush1.bf16.msra.mxu0 %v3428_v16  ;;  %3196 = vmatpush3.bf16.msra.mxu1 %v3432_v17  ;;  %v3503_v16 = vld [vmem:[#allocation2 + $0x340] ss:$24 sps:$4 sm:$0xff]   ;;  %v3942_v17 = vpack.c.bf16 %v3906_v8, %v3906_v8  ;;  %v3510_v8 = vld [vmem:[#allocation2 + $0x15c] ss:$24 sps:$4 sm:$0xff]  }
 0x153   :  { %1402 = vmatprep.subr.bf16.mxu0 %v3435_v18  ;;  %3197 = vmatprep.subr.bf16.mxu1 %v3436_v19  ;;  %v3498_v18 = vld [vmem:[#allocation2 + $0xfc] ss:$24 sps:$4 sm:$0xff]  }
 0x154   :  { %v3501_v19 = vld [vmem:[#allocation2 + $0x33c] ss:$24 sps:$4 sm:$0xff]  }
 0x156   :  { %1403 = vmatpush1.bf16.msra.mxu0 %v3433_v20  ;;  %3198 = vmatpush3.bf16.msra.mxu1 %v3437_v21  ;;  %v3506_v20 = vld [vmem:[#allocation2 + $0x130] ss:$24 sps:$4 sm:$0xff]  }
 0x157   :  { %1404 = vmatprep.subr.bf16.mxu0 %v3440_v22  ;;  %3199 = vmatprep.subr.bf16.mxu1 %v3441_v23  ;;  %v3509_v21 = vld [vmem:[#allocation2 + $0x370] ss:$24 sps:$4 sm:$0xff]   ;;  %v3504_v22 = vld [vmem:[#allocation2 + $0x12c] ss:$24 sps:$4 sm:$0xff]  }
 0x158   :  { %v3507_v23 = vld [vmem:[#allocation2 + $0x36c] ss:$24 sps:$4 sm:$0xff]  }
 0x15a   :  { %1405 = vmatpush1.bf16.msra.mxu0 %v3438_v24  ;;  %3200 = vmatpush3.bf16.msra.mxu1 %v3442_v25  ;;  %v3512_v24 = vld [vmem:[#allocation2 + $0x160] ss:$24 sps:$4 sm:$0xff]  }
 0x15b   :  { %1406 = vmatprep.subr.bf16.mxu0 %v3445_v27  ;;  %3201 = vmatprep.subr.bf16.mxu1 %v3446_v29  ;;  %v3515_v25 = vld [vmem:[#allocation2 + $0x3a0] ss:$24 sps:$4 sm:$0xff]   ;;  %v3513_v27 = vld [vmem:[#allocation2 + $0x39c] ss:$24 sps:$4 sm:$0xff]   ;;  %v3518_v29 = vld [vmem:[#allocation2 + $0x190] ss:$24 sps:$4 sm:$0xff]  }
 0x15e   :  { %1407 = vmatpush1.bf16.msra.mxu0 %v3443_v30  ;;  %3202 = vmatpush3.bf16.msra.mxu1 %v3447_v31  ;;  %v3521_v30 = vld [vmem:[#allocation2 + $0x3d0] ss:$24 sps:$4 sm:$0xff]   ;;  %v3516_v31 = vld [vmem:[#allocation2 + $0x18c] ss:$24 sps:$4 sm:$0xff]  }
 0x15f   :  { %1408 = vmatprep.subr.bf16.mxu0 %v3450_v38  ;;  %3203 = vmatprep.subr.bf16.mxu1 %v3451_v41  ;;  %v3519_v38 = vld [vmem:[#allocation2 + $0x3cc] ss:$24 sps:$4 sm:$0xff]   ;;  %v3524_v41 = vld [vmem:[#allocation2 + $0x1c0] ss:$24 sps:$4 sm:$0xff]  }
 0x162   :  { %1409 = vmatpush1.bf16.msra.mxu0 %v3448_v56  ;;  %3204 = vmatpush3.bf16.msra.mxu1 %v3452_v28  ;;  %v3522_v56 = vld [vmem:[#allocation2 + $0x1bc] ss:$24 sps:$4 sm:$0xff]  }
 0x163   :  { %1410 = vmatprep.subr.bf16.mxu0 %v3455_v32  ;;  %3020 = vmatprep.subr.msk.bf16.mxu1 %vm1686_vm1, %v3018_v26  ;;  %v3525_v28 = vld [vmem:[#allocation2 + $0x3fc] ss:$24 sps:$4 sm:$0xff]   ;;  %v3530_v32 = vld [vmem:[#allocation2 + $0x1f0] ss:$24 sps:$4 sm:$0xff]  }
 0x164   :  { %v3533_v26 = vld [vmem:[#allocation2 + $0x430] ss:$24 sps:$4 sm:$0xff]  }
 0x165   :  { %1508 = vmatmul.mubr.bf16.vlgmr.msra.gmra.mrb[12].mxu1 %v3917_v35 }
 0x166   :  { %1411 = vmatpush1.bf16.msra.mxu0 %v3453_v34  ;;  %1697 = vmatpush1.bf16.msra.mxu1 %v1688_v36  ;;  %v3531_v34 = vld [vmem:[#allocation2 + $0x42c] ss:$24 sps:$4 sm:$0xff]   ;;  %v3539_v36 = vld [vmem:[#allocation2 + $0x460] ss:$24 sps:$4 sm:$0xff]  }
 0x167   :  { %1412 = vmatprep.subr.bf16.mxu0 %v3460_v37  ;;  %1728 = vmatprep.mubr.bf16.mxu1 %v3723_v0  ;;  %v3465_v0 = vld [vmem:[#allocation2 + $0x510] ss:$24 sps:$4 sm:$0xff]   ;;  %v3534_v37 = vld [vmem:[#allocation2 + $0x21c] ss:$24 sps:$4 sm:$0xff]  }
 0x168   :  { %3323 = vmatprep.subr.bf16.mxu1 %v3724_v11 }
 0x16a   :  { %1413 = vmatpush1.bf16.msra.mxu0 %v3458_v39  ;;  %v3537_v39 = vld [vmem:[#allocation2 + $0x45c] ss:$24 sps:$4 sm:$0xff]  }
 0x16b   :  { %1414 = vmatprep.subr.bf16.mxu0 %v3463_v42  ;;  %v3545_v42 = vld [vmem:[#allocation2 + $0x490] ss:$24 sps:$4 sm:$0xff]  }
 0x16d   :  { %3021 = vmatmul.mubr.msk.bf16.vlgmr.msra.gmra.mrb[16].mxu1 %vm1682_vm2, %v1673_v44 }
 0x16e   :  { %1415 = vmatpush1.bf16.msra.mxu0 %v3461_v46  ;;  %3324 = vmatpush3.bf16.msra.mxu1 %v1694_v47  ;;  %v3548_v46 = vld [vmem:[#allocation2 + $0x280] ss:$24 sps:$4 sm:$0xff]  }
 0x16f   :  { %1416 = vmatprep.subr.bf16.mxu0 %v3467_v48  ;;  %3325 = vmatprep.mubr.msk.bf16.mxu1 %vm3726_vm3, %v3724_v11  ;;  %v3482_v11 = vld [vmem:[#allocation2 + $0x70] ss:$24 sps:$4 sm:$0xff]   ;;  %v3551_v47 = vld [vmem:[#allocation2 + $0x4c0] ss:$24 sps:$4 sm:$0xff]   ;;  %v3546_v48 = vld [vmem:[#allocation2 + $0x27c] ss:$24 sps:$4 sm:$0xff]  }
 0x170   :  { %2289 = vmatprep.subr.bf16.mxu1 %v3470_v49  ;;  %v3549_v49 = vld [vmem:[#allocation2 + $0x4bc] ss:$24 sps:$4 sm:$0xff]  }
 0x172   :  { %1417 = vmatpush1.bf16.msra.mxu0 %v3465_v0  ;;  %v3554_v0 = vld [vmem:[#allocation2 + $0x2b0] ss:$24 sps:$4 sm:$0xff]  }
 0x173   :  { %1418 = vmatprep.subr.bf16.mxu0 %v3473_v50  ;;  %v3557_v50 = vld [vmem:[#allocation2 + $0x4f0] ss:$24 sps:$4 sm:$0xff]  }
 0x175   :  { %3326 = vmatmul.mubr.msk.bf16.vlgmr.msra.gmra.mrb[20].mxu1 %vm1682_vm2, %v1673_v44  ;;  %v3543_v44 = vld [vmem:[#allocation2 + $0x48c] ss:$24 sps:$4 sm:$0xff]  }
 0x176   :  { %2290 = vmatpush1.bf16.msra.mxu1 %v3468_v51  ;;  %1419 = vmatpush1.bf16.msra.mxu0 %v3471_v52  ;;  %v3552_v51 = vld [vmem:[#allocation2 + $0x2ac] ss:$24 sps:$4 sm:$0xff]  }
 0x177   :  { %2321 = vmatprep.mubr.bf16.mxu1 %v3936_v58  ;;  %2291 = vmatprep.subr.bf16.mxu1 %v3476_v53  ;;  %v3555_v52 = vld [vmem:[#allocation2 + $0x4ec] ss:$24 sps:$4 sm:$0xff]   ;;  %v3560_v53 = vld [vmem:[#allocation2 + $0x2e0] ss:$24 sps:$4 sm:$0xff]  }
 0x178   :  { %1420 = vmatprep.subr.bf16.mxu0 %v3479_v54  ;;  %v3563_v54 = vld [vmem:[#allocation2 + $0x520] ss:$24 sps:$4 sm:$0xff]  }
 0x17a   :  { %2292 = vmatpush1.bf16.msra.mxu1 %v3474_v57  ;;  %1421 = vmatpush1.bf16.msra.mxu0 %v3477_v10  ;;  %v3558_v57 = vld [vmem:[#allocation2 + $0x2dc] ss:$24 sps:$4 sm:$0xff]  }
 0x17b   :  { %2293 = vmatprep.subr.bf16.mxu1 %v3482_v11  ;;  %1422 = vmatprep.subr.bf16.mxu0 %v3485_v1  ;;  %v3561_v10 = vld [vmem:[#allocation2 + $0x51c] ss:$24 sps:$4 sm:$0xff]   ;;  %v3567_v1 = vld [vmem:[#allocation2 + $0x550] ss:$24 sps:$4 sm:$0xff]  }
 0x17c   :  { %v3564_v11 = vld [vmem:[#allocation2 + $0x194] ss:$24 sps:$4 sm:$0xff]  }
 0x17e   :  { %2294 = vmatpush1.bf16.msra.mxu1 %v3480_v7  ;;  %1423 = vmatpush1.bf16.msra.mxu0 %v3483_v2  ;;  %v3568_v7 = vld [vmem:[#allocation2 + $0x14] ss:$24 sps:$4 sm:$0xff]   ;;  %v1669_v2 = vpack.c.bf16 %v3908_v62, %v3908_v62 }
 0x17f   :  { %2295 = vmatprep.subr.bf16.mxu1 %v3488_v3  ;;  %1424 = vmatprep.subr.bf16.mxu0 %v3491_v5  ;;  %v3565_v3 = vld [vmem:[#allocation2 + $0x54c] ss:$24 sps:$4 sm:$0xff]  }
 0x180   :  { %v3569_v5 = vld [vmem:[#allocation2 + $0x1c4] ss:$24 sps:$4 sm:$0xff]  }
 0x181   :  { %v3575_v62 = vld [vmem:[#allocation2 + $0x5ac] ss:$24 sps:$4 sm:$0xff]  }
 0x182   :  { %2296 = vmatpush1.bf16.msra.mxu1 %v3486_v60  ;;  %1425 = vmatpush1.bf16.msra.mxu0 %v3489_v6  ;;  %v3572_v60 = vld [vmem:[#allocation2 + $0x580] ss:$24 sps:$4 sm:$0xff]   ;;  %v3573_v6 = vld [vmem:[#allocation2 + $0x44] ss:$24 sps:$4 sm:$0xff]  }
 0x183   :  { %2297 = vmatprep.subr.bf16.mxu1 %v3494_v9  ;;  %2330 = vmatprep.subr.bf16.mxu0 %v3497_v12  ;;  %v3570_v9 = vld [vmem:[#allocation2 + $0x57c] ss:$24 sps:$4 sm:$0xff]  }
 0x184   :  { %v3574_v12 = vld [vmem:[#allocation2 + $0x1f4] ss:$24 sps:$4 sm:$0xff]  }
 0x185   :  { %1427 = vmatmul.mubr.bf16.vlgmr.msra.gmra.mrb[0].mxu0 %v3917_v35  ;;  %v3536_v35 = vld [vmem:[#allocation2 + $0x220] ss:$24 sps:$4 sm:$0xff]  }
 0x186   :  { %2298 = vmatpush1.bf16.msra.mxu1 %v3492_v13  ;;  %2331 = vmatpush1.bf16.msra.mxu0 %v3495_v14  ;;  %v3577_v13 = vld [vmem:[#allocation2 + $0x5b0] ss:$24 sps:$4 sm:$0xff]   ;;  %v3578_v14 = vld [vmem:[#allocation2 + $0x74] ss:$24 sps:$4 sm:$0xff]  }
 0x187   :  { %2362 = vmatprep.mubr.bf16.mxu0 %v3942_v17  ;;  %2299 = vmatprep.subr.bf16.mxu1 %v3500_v15  ;;  %v3579_v15 = vld [vmem:[#allocation2 + $0x224] ss:$24 sps:$4 sm:$0xff]  }
 0x188   :  { %2332 = vmatprep.subr.bf16.mxu0 %v3503_v16  ;;  %v3582_v16 = vld [vmem:[#allocation2 + $0x5e0] ss:$24 sps:$4 sm:$0xff]  }
 0x18a   :  { %2300 = vmatpush1.bf16.msra.mxu1 %v3498_v18  ;;  %2333 = vmatpush1.bf16.msra.mxu0 %v3501_v19  ;;  %v3583_v18 = vld [vmem:[#allocation2 + $0xa4] ss:$24 sps:$4 sm:$0xff]   ;;  %v3584_v19 = vld [vmem:[#allocation2 + $0x254] ss:$24 sps:$4 sm:$0xff]  }
 0x18b   :  { %2301 = vmatprep.subr.bf16.mxu1 %v3506_v20  ;;  %2334 = vmatprep.subr.bf16.mxu0 %v3509_v21  ;;  %v3585_v20 = vld [vmem:[#allocation2 + $0xd4] ss:$24 sps:$4 sm:$0xff]   ;;  %v3586_v21 = vld [vmem:[#allocation2 + $0x284] ss:$24 sps:$4 sm:$0xff]  }
 0x18e   :  { %2302 = vmatpush1.bf16.msra.mxu1 %v3504_v22  ;;  %2335 = vmatpush1.bf16.msra.mxu0 %v3507_v23  ;;  %v1671_v22 = vpack.c.bf16 %v3910_v63, %v3910_v63  ;;  %v3587_v23 = vld [vmem:[#allocation2 + $0x104] ss:$24 sps:$4 sm:$0xff]  }
 0x18f   :  { %2303 = vmatprep.subr.bf16.mxu1 %v3512_v24  ;;  %2336 = vmatprep.subr.bf16.mxu0 %v3515_v25  ;;  %v3588_v24 = vld [vmem:[#allocation2 + $0x2b4] ss:$24 sps:$4 sm:$0xff]   ;;  %v3595_v63 = vld [vmem:[#allocation2 + $0x344] ss:$24 sps:$4 sm:$0xff]  }
 0x190   :  { %v3589_v25 = vld [vmem:[#allocation2 + $0x134] ss:$24 sps:$4 sm:$0xff]  }
 0x192   :  { %2304 = vmatpush1.bf16.msra.mxu1 %v3510_v8  ;;  %2337 = vmatpush1.bf16.msra.mxu0 %v3513_v27  ;;  %v3590_v8 = vld [vmem:[#allocation2 + $0x2e4] ss:$24 sps:$4 sm:$0xff]  }
 0x193   :  { %2305 = vmatprep.subr.bf16.mxu1 %v3518_v29  ;;  %2338 = vmatprep.subr.bf16.mxu0 %v3521_v30  ;;  %v3591_v27 = vld [vmem:[#allocation2 + $0x164] ss:$24 sps:$4 sm:$0xff]   ;;  %v3592_v29 = vld [vmem:[#allocation2 + $0x494] ss:$24 sps:$4 sm:$0xff]  }
 0x194   :  { %v3593_v30 = vld [vmem:[#allocation2 + $0x314] ss:$24 sps:$4 sm:$0xff]  }
 0x196   :  { %2306 = vmatpush1.bf16.msra.mxu1 %v3516_v31  ;;  %2339 = vmatpush1.bf16.msra.mxu0 %v3519_v38  ;;  %v3594_v31 = vld [vmem:[#allocation2 + $0x4c4] ss:$24 sps:$4 sm:$0xff]   ;;  %v3596_v38 = vld [vmem:[#allocation2 + $0x4f4] ss:$24 sps:$4 sm:$0xff]  }
 0x197   :  { %2307 = vmatprep.subr.bf16.mxu1 %v3524_v41  ;;  %2340 = vmatprep.subr.bf16.mxu0 %v3527_v55  ;;  %v3597_v41 = vld [vmem:[#allocation2 + $0x374] ss:$24 sps:$4 sm:$0xff]   ;;  %v3598_v55 = vld [vmem:[#allocation2 + $0x524] ss:$24 sps:$4 sm:$0xff]  }
 0x19a   :  { %2308 = vmatpush1.bf16.msra.mxu1 %v3522_v56  ;;  %2341 = vmatpush1.bf16.msra.mxu0 %v3525_v28  ;;  %v3599_v56 = vld [vmem:[#allocation2 + $0x3a4] ss:$24 sps:$4 sm:$0xff]   ;;  %v3600_v28 = vld [vmem:[#allocation2 + $0x554] ss:$24 sps:$4 sm:$0xff]  }
 0x19b   :  { %2309 = vmatprep.subr.bf16.mxu1 %v3530_v32  ;;  %2342 = vmatprep.subr.bf16.mxu0 %v3533_v26  ;;  %v3601_v32 = vld [vmem:[#allocation2 + $0x3d4] ss:$24 sps:$4 sm:$0xff]   ;;  %v3602_v26 = vld [vmem:[#allocation2 + $0x584] ss:$24 sps:$4 sm:$0xff]  }
 0x19e   :  { %2310 = vmatpush1.bf16.msra.mxu1 %v3528_v33  ;;  %2343 = vmatpush1.bf16.msra.mxu0 %v3531_v34  ;;  %v3603_v33 = vld [vmem:[#allocation2 + $0x404] ss:$24 sps:$4 sm:$0xff]   ;;  %v3604_v34 = vld [vmem:[#allocation2 + $0x5b4] ss:$24 sps:$4 sm:$0xff]  }
 0x19f   :  { %2311 = vmatprep.subr.bf16.mxu1 %v3536_v35  ;;  %2344 = vmatprep.subr.bf16.mxu0 %v3539_v36  ;;  %v3606_v35 = vld [vmem:[#allocation2 + $0x5e4] ss:$24 sps:$4 sm:$0xff]  }
 0x1a0   :  { %v3607_v36 = vld [vmem:[#allocation2 + $0x464] ss:$24 sps:$4 sm:$0xff]  }
 0x1a2   :  { %2312 = vmatpush1.bf16.msra.mxu1 %v3534_v37  ;;  %2345 = vmatpush1.bf16.msra.mxu0 %v3537_v39  ;;  %v3608_v37 = vld [vmem:[%s4184_s4 + $0xc0] sm:$0xff]  }
 0x1a3   :  { %2313 = vmatprep.subr.bf16.mxu1 %v3542_v40  ;;  %2346 = vmatprep.subr.bf16.mxu0 %v3545_v42  ;;  %v3609_v39 = vld [vmem:[%s4184_s4 + $0x40] sm:$0xff]  }
 0x1a4   :  { %v3610_v40 = vld [vmem:[%s4184_s4 + $0x80] sm:$0xff]  }
 0x1a5   :  { %v3611_v42 = vld [vmem:[%s4184_s4] sm:$0xff]  }
 0x1a6   :  { %2314 = vmatpush1.bf16.msra.mxu1 %v3540_v43  ;;  %2347 = vmatpush1.bf16.msra.mxu0 %v3543_v44  ;;  %v3612_v43 = vld [vmem:[%s4184_s4 + $0xc8] sm:$0xff]  }
 0x1a7   :  { %2315 = vmatprep.subr.bf16.mxu1 %v3548_v46  ;;  %2348 = vmatprep.subr.bf16.mxu0 %v3551_v47  ;;  %v3613_v44 = vld [vmem:[%s4184_s4 + $0x48] sm:$0xff]  }
 0x1a8   :  { %v3614_v46 = vld [vmem:[%s4184_s4 + $0x88] sm:$0xff]  }
 0x1a9   :  { %v3615_v47 = vld [vmem:[%s4184_s4 + $0x8] sm:$0xff]  }
 0x1aa   :  { %2316 = vmatpush1.bf16.msra.mxu1 %v3546_v48  ;;  %2349 = vmatpush1.bf16.msra.mxu0 %v3549_v49  ;;  %v3616_v48 = vld [vmem:[%s4184_s4 + $0xd0] sm:$0xff]  }
 0x1ab   :  { %2317 = vmatprep.subr.bf16.mxu1 %v3554_v0  ;;  %2350 = vmatprep.subr.bf16.mxu0 %v3557_v50  ;;  %v3617_v49 = vld [vmem:[%s4184_s4 + $0x50] sm:$0xff]  }
 0x1ac   :  { %v3618_v0 = vld [vmem:[%s4184_s4 + $0x90] sm:$0xff]  }
 0x1ad   :  { %v3619_v50 = vld [vmem:[%s4184_s4 + $0x10] sm:$0xff]  }
 0x1ae   :  { %2318 = vmatpush1.bf16.msra.mxu1 %v3552_v51  ;;  %2351 = vmatpush1.bf16.msra.mxu0 %v3555_v52  ;;  %v3620_v51 = vld [vmem:[%s4184_s4 + $0xd8] sm:$0xff]  }
 0x1af   :  { %2319 = vmatprep.subr.bf16.mxu1 %v3560_v53  ;;  %2352 = vmatprep.subr.bf16.mxu0 %v3563_v54  ;;  %v3621_v52 = vld [vmem:[%s4184_s4 + $0x58] sm:$0xff]  }
 0x1b0   :  { %v3622_v53 = vld [vmem:[%s4184_s4 + $0x98] sm:$0xff]  }
 0x1b1   :  { %v3623_v54 = vld [vmem:[%s4184_s4 + $0x18] sm:$0xff]  }
 0x1b2   :  { %2320 = vmatpush1.bf16.msra.mxu1 %v3558_v57  ;;  %2353 = vmatpush1.bf16.msra.mxu0 %v3561_v10 }
 0x1b3   :  { %3213 = vmatprep.subr.bf16.mxu1 %v3564_v11  ;;  %2354 = vmatprep.subr.bf16.mxu0 %v3567_v1 }
 0x1b5   :  { %2322 = vmatmul.mubr.bf16.vlgmr.msra.gmra.mrb[24].mxu1 %v1669_v2 }
 0x1b6   :  { %3214 = vmatpush3.bf16.msra.mxu1 %v3568_v7  ;;  %2403 = vmatprep.mubr.bf16.mxu1 %v3936_v58  ;;  %v3580_v58 = vld [vmem:[#allocation2 + $0x5dc] ss:$24 sps:$4 sm:$0xff]   ;;  %v3624_v7 = vld [vmem:[%s4184_s4 + $0xe0] sm:$0xff]  }
 0x1b7   :  { %2355 = vmatpush1.bf16.msra.mxu0 %v3565_v3  ;;  %3215 = vmatprep.subr.bf16.mxu1 %v3569_v5  ;;  %v3625_v3 = vld [vmem:[%s4184_s4 + $0x60] sm:$0xff]  }
 0x1b8   :  { %2356 = vmatprep.subr.bf16.mxu0 %v3572_v60  ;;  %v3626_v5 = vld [vmem:[%s4184_s4 + $0xa0] sm:$0xff]  }
 0x1b9   :  { %v3627_v60 = vld [vmem:[%s4184_s4 + $0x20] sm:$0xff]  }
 0x1ba   :  { %3216 = vmatpush3.bf16.msra.mxu1 %v3573_v6  ;;  %v3628_v6 = vld [vmem:[%s4184_s4 + $0xe8] sm:$0xff]  }
 0x1bb   :  { %2357 = vmatpush1.bf16.msra.mxu0 %v3570_v9  ;;  %3217 = vmatprep.subr.bf16.mxu1 %v3574_v12  ;;  %v3629_v9 = vld [vmem:[%s4184_s4 + $0x68] sm:$0xff]  }
 0x1bc   :  { %2358 = vmatprep.subr.bf16.mxu0 %v3577_v13  ;;  %v3630_v12 = vld [vmem:[%s4184_s4 + $0xa8] sm:$0xff]  }
 0x1bd   :  { %v3631_v13 = vld [vmem:[%s4184_s4 + $0x28] sm:$0xff]  }
 0x1be   :  { %3218 = vmatpush3.bf16.msra.mxu1 %v3578_v14  ;;  %v3632_v14 = vld [vmem:[%s4184_s4 + $0xf0] sm:$0xff]  }
 0x1bf   :  { %2359 = vmatpush1.bf16.msra.mxu0 %v3575_v62  ;;  %3219 = vmatprep.subr.bf16.mxu1 %v3579_v15  ;;  %v3633_v62 = vld [vmem:[%s4184_s4 + $0x70] sm:$0xff]  }
 0x1c0   :  { %2360 = vmatprep.subr.bf16.mxu0 %v3582_v16  ;;  %v3634_v15 = vld [vmem:[%s4184_s4 + $0xb0] sm:$0xff]  }
 0x1c1   :  { %v3635_v16 = vld [vmem:[%s4184_s4 + $0x30] sm:$0xff]  }
 0x1c2   :  { %3220 = vmatpush3.bf16.msra.mxu1 %v3583_v18  ;;  %v3636_v18 = vld [vmem:[%s4184_s4 + $0xf8] sm:$0xff]  }
 0x1c3   :  { %2361 = vmatpush1.bf16.msra.mxu0 %v3580_v58  ;;  %3221 = vmatprep.subr.bf16.mxu1 %v3584_v19  ;;  %v3637_v58 = vld [vmem:[%s4184_s4 + $0x78] sm:$0xff]  }
 0x1c4   :  { %3257 = vmatprep.subr.bf16.mxu0 %v3609_v39  ;;  %v3638_v19 = vld [vmem:[%s4184_s4 + $0xb8] sm:$0xff]  }
 0x1c6   :  { %2363 = vmatmul.mubr.bf16.vlgmr.msra.gmra.mrb[4].mxu0 %v1671_v22  ;;  %3222 = vmatpush3.bf16.msra.mxu1 %v3585_v20  ;;  %v3639_v20 = vld [vmem:[%s4184_s4 + $0x38] sm:$0xff]  }
 0x1c7   :  { %3223 = vmatprep.subr.bf16.mxu1 %v3586_v21  ;;  %3258 = vmatpush3.bf16.msra.mxu0 %v3611_v42  ;;  %v3640_v21 = vld [vmem:[%s4184_s4 + $0x140] sm:$0xff]  }
 0x1c8   :  { %3259 = vmatprep.subr.bf16.mxu0 %v3613_v44 }
 0x1ca   :  { %3224 = vmatpush3.bf16.msra.mxu1 %v3587_v23 }
 0x1cb   :  { %3225 = vmatprep.subr.bf16.mxu1 %v3588_v24  ;;  %3260 = vmatpush3.bf16.msra.mxu0 %v3615_v47 }
 0x1cc   :  { %3261 = vmatprep.subr.bf16.mxu0 %v3617_v49 }
 0x1ce   :  { %3226 = vmatpush3.bf16.msra.mxu1 %v3589_v25 }
 0x1cf   :  { %3227 = vmatprep.subr.bf16.mxu1 %v3590_v8  ;;  %3262 = vmatpush3.bf16.msra.mxu0 %v3619_v50 }
 0x1d0   :  { %3263 = vmatprep.subr.bf16.mxu0 %v3621_v52 }
 0x1d2   :  { %3228 = vmatpush3.bf16.msra.mxu1 %v3591_v27 }
 0x1d3   :  { %3235 = vmatprep.subr.bf16.mxu1 %v3592_v29  ;;  %3264 = vmatpush3.bf16.msra.mxu0 %v3623_v54 }
 0x1d4   :  { %3265 = vmatprep.subr.bf16.mxu0 %v3625_v3 }
 0x1d5   :  { %2404 = vmatmul.mubr.bf16.vlgmr.msra.gmra.mrb[28].mxu1 %v1669_v2 }
 0x1d6   :  { %3236 = vmatpush3.bf16.msra.mxu1 %v3593_v30  ;;  %2443 = vmatprep.mubr.bf16.mxu1 %v3942_v17  ;;  %v3605_v17 = vld [vmem:[#allocation2 + $0x434] ss:$24 sps:$4 sm:$0xff]  }
 0x1d7   :  { %3237 = vmatprep.subr.bf16.mxu1 %v3594_v31  ;;  %3266 = vmatpush3.bf16.msra.mxu0 %v3627_v60 }
 0x1d8   :  { %3267 = vmatprep.subr.bf16.mxu0 %v3629_v9 }
 0x1da   :  { %3238 = vmatpush3.bf16.msra.mxu1 %v3595_v63 }
 0x1db   :  { %3239 = vmatprep.subr.bf16.mxu1 %v3596_v38  ;;  %3268 = vmatpush3.bf16.msra.mxu0 %v3631_v13 }
 0x1dc   :  { %3269 = vmatprep.subr.bf16.mxu0 %v3633_v62 }
 0x1de   :  { %3240 = vmatpush3.bf16.msra.mxu1 %v3597_v41 }
 0x1df   :  { %3241 = vmatprep.subr.bf16.mxu1 %v3598_v55  ;;  %3270 = vmatpush3.bf16.msra.mxu0 %v3635_v16 }
 0x1e0   :  { %3271 = vmatprep.subr.bf16.mxu0 %v3637_v58 }
 0x1e2   :  { %3242 = vmatpush3.bf16.msra.mxu1 %v3599_v56 }
 0x1e3   :  { %3243 = vmatprep.subr.bf16.mxu1 %v3600_v28  ;;  %3272 = vmatpush3.bf16.msra.mxu0 %v3639_v20 }
 0x1e4   :  { %3301 = vmatprep.subr.bf16.mxu0 %v3640_v21 }
 0x1e6   :  { %3244 = vmatpush3.bf16.msra.mxu1 %v3601_v32 }
 0x1e7   :  { %3245 = vmatprep.subr.bf16.mxu1 %v3602_v26 }
 0x1ea   :  { %3246 = vmatpush3.bf16.msra.mxu1 %v3603_v33 }
 0x1eb   :  { %3247 = vmatprep.subr.bf16.mxu1 %v3604_v34 }
 0x1ee   :  { %3248 = vmatpush3.bf16.msra.mxu1 %v3605_v17 }
 0x1ef   :  { %3249 = vmatprep.subr.bf16.mxu1 %v3606_v35 }
 0x1f2   :  { %3250 = vmatpush3.bf16.msra.mxu1 %v3607_v36 }
 0x1f3   :  { %3279 = vmatprep.subr.bf16.mxu1 %v3608_v37 }
 0x1f5   :  { %2444 = vmatmul.mubr.bf16.vlgmr.msra.gmra.mrb[32].mxu1 %v1671_v22  ;;  %v2911_v22 = vld [vmem:[%s4185_s5 + $0x5] ss:$8 sm:$0x7] }
 0x1f6   :  { %3280 = vmatpush3.bf16.msra.mxu1 %v3610_v40  ;;  %v837_v23 = vrot.slane %v2911_v22, %v3806_v4  ;;  %v829_v42 = vrot.slane %v2911_v22, %v3795_v59  ;;  %v833_v44 = vrot.slane %v2911_v22, %v3801_v61 }
 0x1f7   :  { %3281 = vmatprep.subr.bf16.mxu1 %v3612_v43 }
 0x1fa   :  { %3282 = vmatpush3.bf16.msra.mxu1 %v3614_v46 }
 0x1fb   :  { %3283 = vmatprep.subr.bf16.mxu1 %v3616_v48 }
 0x1fe   :  { %3284 = vmatpush3.bf16.msra.mxu1 %v3618_v0 }
 0x1ff   :  { %3285 = vmatprep.subr.bf16.mxu1 %v3620_v51 }
 0x202   :  { %3286 = vmatpush3.bf16.msra.mxu1 %v3622_v53 }
 0x203   :  { %3287 = vmatprep.subr.bf16.mxu1 %v3624_v7 }
 0x206   :  { %3288 = vmatpush3.bf16.msra.mxu1 %v3626_v5 }
 0x207   :  { %3289 = vmatprep.subr.bf16.mxu1 %v3628_v6 }
 0x20a   :  { %3290 = vmatpush3.bf16.msra.mxu1 %v3630_v12 }
 0x20b   :  { %3291 = vmatprep.subr.bf16.mxu1 %v3632_v14 }
 0x20e   :  { %3292 = vmatpush3.bf16.msra.mxu1 %v3634_v15 }
 0x20f   :  { %3293 = vmatprep.subr.bf16.mxu1 %v3636_v18 }
 0x212   :  { %3294 = vmatpush3.bf16.msra.mxu1 %v3638_v19 }
 0x218   :  { %v3183_v57 = vpop.f32.mrb[8].mxu1 }
 0x219   :  { %v3184_v10 = vpop.f32.mrb[9].mxu1 }
 0x21a   :  { %v3185_v11 = vadd.f32 %v3184_v10, %v3183_v57  ;;  %v3186_v1 = vpop.f32.mrb[10].mxu1 }
 0x21b   :  { %v3187_v2 = vpop.f32.mrb[11].mxu1 }
 0x21c   :  { %v1470_v8 = vadd.f32 %v3185_v11, %v837_v23 }
 0x238   :  { %v3205_v24 = vpop.f32.mrb[12].mxu1 }
 0x239   :  { %v3206_v25 = vpop.f32.mrb[13].mxu1 }
 0x23a   :  { %v3207_v27 = vadd.f32 %v3206_v25, %v3205_v24  ;;  %v3208_v29 = vpop.f32.mrb[14].mxu1 }
 0x23b   :  { %v3209_v30 = vpop.f32.mrb[15].mxu1 }
 0x23c   :  { %v1510_v31 = vadd.f32 %v3207_v27, %v1470_v8 }
 0x23e   :  { %v4054_v63 = vmax.f32 %v1510_v31, 0.0 }
 0x240   :  { %v1530_v38 = vrot.slane %v4054_v63, 4  ;;  %v4057_v41 = vpop.f32.mrb[16].mxu1 }
 0x241   :  { %v4059_v55 = vpop.f32.mrb[17].mxu1 }
 0x242   :  { %v1531_v56 = vadd.f32 %v1530_v38, %v4054_v63  ;;  %v1734_v28 = vpop.f32.mrb[18].mxu1 }
 0x243   :  { %v1735_v32 = vpop.f32.mrb[19].mxu1 }
 0x244   :  { %v1532_v26 = vrot.slane %v1531_v56, 2 }
 0x246   :  { %v1533_v33 = vadd.f32 %v1532_v26, %v1531_v56 }
 0x248   :  { %v4062_v34 = vpop.f32.mrb[20].mxu1  ;;  %v1534_v35 = vrot.slane %v1533_v33, 1 }
 0x249   :  { %v3327_v17 = vpop.f32.mrb[21].mxu1 }
 0x24a   :  { %v1774_v36 = vpop.f32.mrb[22].mxu1  ;;  %v1535_v39 = vadd.f32 %v1534_v35, %v1533_v33 }
 0x24b   :  { %v3328_v37 = vpop.f32.mrb[23].mxu1 }
 0x24c   :  { %v4064_v40 = vmul.f32 0.125, %v1535_v39 }
 0x24e   :  { %v1541_v43 = vsub.f32 %v4054_v63, %v4064_v40 }
 0x250   :  { %v1544_v49 = vmul.f32 %v1541_v43, %v1541_v43 }
 0x252   :  { %v1557_v57 = vrot.slane %v1544_v49, 4 }
 0x254   :  { %v1558_v2 = vadd.f32 %v1557_v57, %v1544_v49 }
 0x256   :  { %v1559_v9 = vrot.slane %v1558_v2, 2 }
 0x258   :  { %v1428_v46 = vpop.f32.mrb[0].mxu0  ;;  %v1560_v15 = vadd.f32 %v1559_v9, %v1558_v2 }
 0x259   :  { %v3329_v47 = vadd.f32 %v1428_v46, %v829_v42  ;;  %v1430_v48 = vpop.f32.mrb[1].mxu0 }
 0x25a   :  { %v3330_v0 = vadd.f32 %v1430_v48, %v833_v44  ;;  %v1432_v50 = vpop.f32.mrb[2].mxu0  ;;  %v1561_v20 = vrot.slane %v1560_v15, 1 }
 0x25b   :  { %v4070_v51 = vmax.f32 %v3329_v47, 0.0  ;;  %v1433_v52 = vpop.f32.mrb[3].mxu0 }
 0x25c   :  { %v4072_v53 = vmax.f32 %v3330_v0, 0.0  ;;  %v1562_v25 = vadd.f32 %v1561_v20, %v1560_v15 }
 0x25d   :  { %v1518_v54 = vrot.slane %v4070_v51, 4 }
 0x25e   :  { %v1524_v10 = vrot.slane %v4072_v53, 4  ;;  %v1565_v31 = vmul.f32 0.125, %v1562_v25 }
 0x25f   :  { %v1519_v11 = vadd.f32 %v1518_v54, %v4070_v51 }
 0x260   :  { %v1525_v1 = vadd.f32 %v1524_v10, %v4072_v53  ;;  %v1568_v26 = vadd.f32 1e-05, %v1565_v31  ;;  %v2912_v10 = vld [vmem:[%s4185_s5 + $0x6] ss:$8 sm:$0x7] }
 0x261   :  { %v1520_v7 = vrot.slane %v1519_v11, 2 }
 0x262   :  { %v1526_v3 = vrot.slane %v1525_v1, 2  ;;  %3664 = vrsqrt.f32 %v1568_v26 }
 0x263   :  { %v1521_v5 = vadd.f32 %v1520_v7, %v1519_v11 }
 0x264   :  { %v1527_v60 = vadd.f32 %v1526_v3, %v1525_v1 }
 0x265   :  { %v1522_v6 = vrot.slane %v1521_v5, 1 }
 0x266   :  { %v1528_v12 = vrot.slane %v1527_v60, 1 }
 0x267   :  { %v1523_v13 = vadd.f32 %v1522_v6, %v1521_v5 }
 0x268   :  { %v1529_v14 = vadd.f32 %v1528_v12, %v1527_v60 }
 0x269   :  { %v1536_v62 = vmul.f32 0.125, %v1523_v13 }
 0x26a   :  { %v1537_v16 = vmul.f32 0.125, %v1529_v14 }
 0x26b   :  { %v1539_v18 = vsub.f32 %v4070_v51, %v1536_v62 }
 0x26c   :  { %v1540_v58 = vsub.f32 %v4072_v53, %v1537_v16  ;;  %v3665_v39 = vpop.eup %3664 }
 0x26d   :  { %v1542_v19 = vmul.f32 %v1539_v18, %v1539_v18  ;;  %v1589_v54 = vrot.slane %v3665_v39, %v3847_v45  ;;  %v3644_v39 = vld [vmem:[%s4184_s4 + $0x150] sm:$0xff]  }
 0x26e   :  { %v1543_v21 = vmul.f32 %v1540_v58, %v1540_v58 }
 0x26f   :  { %v1545_v22 = vrot.slane %v1542_v19, 4 }
 0x270   :  { %v1551_v23 = vrot.slane %v1543_v21, 4 }
 0x271   :  { %v1546_v24 = vadd.f32 %v1545_v22, %v1542_v19  ;;  %v2913_v22 = vld [vmem:[%s4185_s5 + $0x7] ss:$8 sm:$0x7] }
 0x272   :  { %v1552_v8 = vadd.f32 %v1551_v23, %v1543_v21 }
 0x273   :  { %v1547_v27 = vrot.slane %v1546_v24, 2 }
 0x274   :  { %v1553_v29 = vrot.slane %v1552_v8, 2 }
 0x275   :  { %v1548_v30 = vadd.f32 %v1547_v27, %v1546_v24 }
 0x276   :  { %v1554_v38 = vadd.f32 %v1553_v29, %v1552_v8 }
 0x277   :  { %v1549_v56 = vrot.slane %v1548_v30, 1 }
 0x278   :  { %v1555_v28 = vrot.slane %v1554_v38, 1 }
 0x279   :  { %v1550_v32 = vadd.f32 %v1549_v56, %v1548_v30 }
 0x27a   :  { %v1556_v33 = vadd.f32 %v1555_v28, %v1554_v38 }
 0x27b   :  { %v1563_v17 = vmul.f32 0.125, %v1550_v32 }
 0x27c   :  { %v1564_v35 = vmul.f32 0.125, %v1556_v33  ;;  %v3642_v33 = vld [vmem:[%s4184_s4 + $0x148] sm:$0xff]  }
 0x27d   :  { %v1566_v36 = vadd.f32 1e-05, %v1563_v17 }
 0x27e   :  { %v1567_v37 = vadd.f32 1e-05, %v1564_v35 }
 0x27f   :  { %3666 = vrsqrt.f32 %v1566_v36  ;;  %v3643_v36 = vld [vmem:[%s4184_s4 + $0x108] sm:$0xff]  }
 0x280   :  { %3668 = vrsqrt.f32 %v1567_v37 }
 0x288   :  { %v2323_v42 = vpop.f32.mrb[24].mxu1 }
 0x289   :  { %v3667_v43 = vpop.eup %3666  ;;  %v2324_v44 = vadd.f32 %v2323_v42, %v4057_v41  ;;  %v2325_v46 = vpop.f32.mrb[25].mxu1  ;;  %v4091_v41 = vld [vmem:[%s4185_s5 + $0x20] ss:$8 sm:$0x7] }
 0x28a   :  { %v3669_v47 = vpop.eup %3668  ;;  %v2326_v48 = vadd.f32 %v2325_v46, %v4059_v55  ;;  %v2327_v49 = vpop.f32.mrb[26].mxu1  ;;  %v2455_v9 = vrot.slane %v4091_v41, %v3795_v59  ;;  %v3645_v42 = vld [vmem:[%s4184_s4 + $0x110] sm:$0xff]   ;;  %v3649_v46 = vld [vmem:[%s4184_s4 + $0x120] sm:$0xff]  }
 0x28b   :  { %v2328_v0 = vpop.f32.mrb[27].mxu1  ;;  %v1575_v50 = vcombine.low %v3667_v43, %v3669_v47  ;;  %v3646_v43 = vld [vmem:[%s4184_s4 + $0x158] sm:$0xff]   ;;  %v3650_v47 = vld [vmem:[%s4184_s4 + $0x168] sm:$0xff]   ;;  %v3652_v49 = vld [vmem:[%s4184_s4 + $0x170] sm:$0xff]  }
 0x28c   :  { %v3653_v0 = vld [vmem:[%s4184_s4 + $0x130] sm:$0xff]  }
 0x28d   :  { %v1582_v52 = vrot.slane %v1575_v50, %v3847_v45  ;;  %v3654_v50 = vld [vmem:[%s4184_s4 + $0x178] sm:$0xff]  }
 0x28f   :  { %v1590_v57 = vcombine.low %v1582_v52, %v1589_v54  ;;  %v3655_v52 = vld [vmem:[%s4184_s4 + $0x138] sm:$0xff]   ;;  %v2459_v54 = vrot.slane %v4091_v41, %v3801_v61 }
 0x291   :  { %v1597_v11 = vrot.slane %v1590_v57, %v3847_v45 }
 0x293   :  { %v1599_v1 = vmul.f32 %v2912_v10, %v1597_v11 }
 0x295   :  { %v1604_v55 = vrot.slane %v1599_v1, %v3795_v59  ;;  %v1608_v7 = vrot.slane %v1599_v1, %v3801_v61  ;;  %v1612_v2 = vrot.slane %v1599_v1, %v3806_v4  ;;  %v2463_v1 = vrot.slane %v4091_v41, %v3806_v4 }
 0x297   :  { %v1617_v3 = vmul.f32 %v1608_v7, %v4072_v53  ;;  %v1619_v5 = vmul.f32 %v1604_v55, %v1536_v62  ;;  %v1620_v60 = vmul.f32 %v1608_v7, %v1537_v16  ;;  %v1621_v6 = vmul.f32 %v1612_v2, %v4064_v40 }
 0x298   :  { %v1616_v12 = vmul.f32 %v1604_v55, %v4070_v51  ;;  %v1618_v8 = vmul.f32 %v1612_v2, %v4054_v63 }
 0x299   :  { %v2364_v13 = vpop.f32.mrb[4].mxu0  ;;  %v1625_v14 = vcombine.low %v1619_v5, %v1620_v60  ;;  %v1639_v53 = vrot.slane %v1621_v6, %v3847_v45 }
 0x29a   :  { %v2365_v15 = vadd.f32 %v2364_v13, %v2324_v44  ;;  %v2366_v18 = vpop.f32.mrb[5].mxu0  ;;  %v3648_v44 = vld [vmem:[%s4184_s4 + $0x160] sm:$0xff]  }
 0x29b   :  { %v4101_v58 = vadd.f32 %v2366_v18, %v2326_v48  ;;  %v2368_v19 = vpop.f32.mrb[6].mxu0  ;;  %v1632_v20 = vrot.slane %v1625_v14, %v3847_v45  ;;  %v3651_v48 = vld [vmem:[%s4184_s4 + $0x128] sm:$0xff]  }
 0x29c   :  { %v2467_v62 = vadd.f32 %v2455_v9, %v2365_v15  ;;  %v2369_v16 = vpop.f32.mrb[7].mxu0 }
 0x29d   :  { %v1640_v21 = vcombine.low %v1632_v20, %v1639_v53  ;;  %v2468_v7 = vadd.f32 %v2459_v54, %v4101_v58 }
 0x29e   :  { %v2470_v40 = vmax.f32 %v2467_v62, 0.0 }
 0x29f   :  { %v1647_v51 = vrot.slane %v1640_v21, %v3847_v45  ;;  %v3641_v45 = vld [vmem:[%s4184_s4 + $0x100] sm:$0xff]   ;;  %v2471_v60 = vmax.f32 %v2468_v7, 0.0 }
 0x2a0   :  { %v2476_v23 = vpack.c.bf16 %v2470_v40, %v2470_v40 }
 0x2a1   :  { %v1649_v24 = vsub.f32 %v2913_v22, %v1647_v51 }
 0x2a2   :  { %2839 = vmatprep.mubr.bf16.mxu1 %v2476_v23 }
 0x2a3   :  { %v1658_v25 = vrot.slane %v1649_v24, %v3801_v61  ;;  %v1662_v27 = vrot.slane %v1649_v24, %v3806_v4  ;;  %v1654_v29 = vrot.slane %v1649_v24, %v3795_v59  ;;  %v416_v4 = vld [vmem:[%s4185_s5 + $0x21] ss:$0 sm:$0xff]  ;;  %s3694_s5 = scalar_lea.vmem %s2899_s29, 128 }
 0x2a4   :  { %p3695_p8 = scmp.ne.s32.totalorder %s2899_s29, %s3694_s5  ;;  %p3700_p10 = scmp.lt.s32.totalorder %s3694_s5, %s3694_s5 }
 0x2a5   :  { %v1667_v30 = vadd.f32 %v1658_v25, %v1617_v3  ;;  %v1668_v31 = vadd.f32 %v1662_v27, %v1618_v8  ;;  %v1666_v38 = vadd.f32 %v1654_v29, %v1616_v12  ;;  %v2477_v12 = vpack.c.bf16 %v2471_v60, %v2471_v60 }
 0x2a6   :  { %p3701_p11 = por %p3700_p10, %p3699_p9 }
 0x2a7   :  { %v2474_v56 = vpack.c.bf16 %v1667_v30, %v1667_v30  ;;  %v2475_v28 = vpack.c.bf16 %v1668_v31, %v1668_v31  ;;  %v2473_v32 = vpack.c.bf16 %v1666_v38, %v1666_v38 }
 0x2a8   :  { %v3229_v26 = vpop.f32.mrb[28].mxu1  ;;  %p3702_p12 = pnand %p3701_p11, %p3695_p8 }
 0x2a9   :  { %v3230_v63 = vpop.f32.mrb[29].mxu1  ;;  %2799 = vmatprep.mubr.bf16.mxu0 %v2474_v56  ;;  %2840 = vmatmul.mubr.bf16.vlgmr.msra.gmra.mrb[36].mxu1 %v2475_v28 }
 0x2aa   :  { %v3231_v17 = vadd.f32 %v3230_v63, %v3229_v26  ;;  %v3232_v59 = vpop.f32.mrb[30].mxu1  ;;  %2800 = vmatmul.mubr.bf16.vlgmr.msra.gmra.mrb[8].mxu0 %v2473_v32 }
 0x2ab   :  { %v3233_v35 = vpop.f32.mrb[31].mxu1  ;;  %3302 = vmatpush3.bf16.msra.mxu0 %v3641_v45 }
 0x2ac   :  { %v2406_v37 = vadd.f32 %v3231_v17, %v4062_v34  ;;  %3303 = vmatprep.subr.bf16.mxu0 %v3642_v33  ;;  %v3647_v34 = vld [vmem:[%s4184_s4 + $0x118] sm:$0xff]  }
 0x2af   :  { %3304 = vmatpush3.bf16.msra.mxu0 %v3643_v36 }
 0x2b0   :  { %3305 = vmatprep.subr.bf16.mxu0 %v3644_v39 }
 0x2b3   :  { %3306 = vmatpush3.bf16.msra.mxu0 %v3645_v42 }
 0x2b4   :  { %3307 = vmatprep.subr.bf16.mxu0 %v3646_v43 }
 0x2b7   :  { %3308 = vmatpush3.bf16.msra.mxu0 %v3647_v34 }
 0x2b8   :  { %3309 = vmatprep.subr.bf16.mxu0 %v3648_v44 }
 0x2bb   :  { %3310 = vmatpush3.bf16.msra.mxu0 %v3649_v46 }
 0x2bc   :  { %3311 = vmatprep.subr.bf16.mxu0 %v3650_v47 }
 0x2bf   :  { %3312 = vmatpush3.bf16.msra.mxu0 %v3651_v48 }
 0x2c0   :  { %3313 = vmatprep.subr.bf16.mxu0 %v3652_v49 }
 0x2c3   :  { %3314 = vmatpush3.bf16.msra.mxu0 %v3653_v0 }
 0x2c4   :  { %3315 = vmatprep.subr.bf16.mxu0 %v3654_v50 }
 0x2c7   :  { %3316 = vmatpush3.bf16.msra.mxu0 %v3655_v52 }
 0x2c8   :  { %v3251_v57 = vpop.f32.mrb[32].mxu1 }
 0x2c9   :  { %v3252_v10 = vpop.f32.mrb[33].mxu1 }
 0x2ca   :  { %v3253_v11 = vadd.f32 %v3252_v10, %v3251_v57  ;;  %v3254_v55 = vpop.f32.mrb[34].mxu1 }
 0x2cb   :  { %v3255_v2 = vpop.f32.mrb[35].mxu1 }
 0x2cc   :  { %v2446_v3 = vadd.f32 %v3253_v11, %v2406_v37 }
 0x2ce   :  { %v2469_v5 = vadd.f32 %v2463_v1, %v2446_v3 }
 0x2d0   :  { %v2472_v6 = vmax.f32 %v2469_v5, 0.0 }
 0x2d2   :  { %v2478_v9 = vpack.c.bf16 %v2472_v6, %v2472_v6 }
 0x2d4   :  { %2879 = vmatprep.mubr.bf16.mxu0 %v2478_v9 }
 0x2d5   :  { %2880 = vmatmul.mubr.bf16.vlgmr.msra.gmra.mrb[12].mxu0 %v2477_v12 }
 0x37c   :  { %v3295_v61 = vpop.f32.mrb[36].mxu1 }
 0x37d   :  { %v3273_v13 = vpop.f32.mrb[8].mxu0  ;;  %v3296_v14 = vpop.f32.mrb[37].mxu1 }
 0x37e   :  { %v3297_v15 = vadd.f32 %v3296_v14, %v3295_v61  ;;  %v3274_v41 = vpop.f32.mrb[9].mxu0  ;;  %v3298_v18 = vpop.f32.mrb[38].mxu1 }
 0x37f   :  { %v3275_v58 = vadd.f32 %v3274_v41, %v3273_v13  ;;  %v3276_v19 = vpop.f32.mrb[10].mxu0  ;;  %v3299_v20 = vpop.f32.mrb[39].mxu1 }
 0x380   :  { %v3277_v53 = vpop.f32.mrb[11].mxu0 }
 0x381   :  { %v2802_v62 = vadd.f32 %v3275_v58, %v416_v4 }
 0x383   :  { %v2842_v16 = vadd.f32 %v3297_v15, %v2802_v62 }
 0x3a8   :  { %v3317_v21 = vpop.f32.mrb[12].mxu0 }
 0x3a9   :  { %v3318_v40 = vpop.f32.mrb[13].mxu0 }
 0x3aa   :  { %v3319_v22 = vadd.f32 %v3318_v40, %v3317_v21  ;;  %v3320_v51 = vpop.f32.mrb[14].mxu0 }
 0x3ab   :  { %v3321_v23 = vpop.f32.mrb[15].mxu0 }
 0x3ac   :  { %v2882_v24 = vadd.f32 %v3319_v22, %v2842_v16 }
 0x3ae   :  { %3670 = vtanh.f32 %v2882_v24 }
 0x3b8   :  { %v3671_v25 = vpop.eup %3670 }
 0x3b9   :  { %2889 = vst.msk [vmem:[#allocation5] sm:$0xff] %vm1682_vm2, %v3671_v25 }
 0x3ba   :  { %2891 = vst.msk [vmem:[#allocation5] sm:$0xff] %vm2890_vm4, %v2882_v24 }
 0x3bb   :  { %3705 = shalt.err (!%p3702_p12)
}
 0x3bc   :  { %s3706_s8 = scalar_lea.hbm %s4186_s6, 128 }
 0x3bd   :  { %p3707_p13 = scmp.ne.s32.totalorder %s4186_s6, %s3706_s8  ;;  %p3710_p0 = scmp.lt.u32.totalorder %s3706_s8, %s4186_s6 }
 0x3bf   :  { %p3712_p1 = pnand %p3710_p0, %p3707_p13 }
 0x3c1   :  { %3715 = shalt.err (!%p3712_p1)
}
 0x3c2   :  { %2901 = dma.vmem_to_hbm [thread:$0]  %s2899_s29, 128, %s4186_s6, [#allocation4]  }
 0x3c3   :  { %3718 = dma.done.wait [#allocation4], 128  }
 0x3c4   :  { %3719 = vsyncadd [#allocation4], 4294967168 }
 0x3c5   :  { %2905 = vsyncpa [#allocation3], 1 }
 0x3c6   :  { %2906 = vsyncpa [#allocation4], 1 }

</bundles_post_ra>
